<compile_context>
chip_gen: v6e
topology: v6e:2x2x1
jax: 0.10.0
libtpu: 0.0.40
codegen_flags: <defaults>
</compile_context>

<pallas_src>
import jax
import jax.numpy as jnp
import numpy as np
from jax.experimental import pallas as pl
from jax.experimental.pallas import tpu as pltpu


# ----------------------------- in-kernel ops ------------------------------

def _shift_rows(v, d):
    """Return value w with w[r] = v[r + d] (XLU sublane rotation, f32).

    Wrap-around only ever lands in halo / padding rows whose outputs are masked
    or discarded, so a circular roll is sufficient.
    """
    if d == 0:
        return v
    return pltpu.roll(v, shift=(-d) % v.shape[0], axis=0)


def mbim_kernel(x_ref, mask_ref, m12_ref, c12_ref, m31_ref, c31_ref,
                m32a_ref, m32b_ref, c32_ref, ssum_ref, out_ref):
    mask = mask_ref[...]                                     # (M, 1) f32 row validity

    # branch_1 | branch_2 fused into one conv; the 3 row taps are folded into the
    # contraction (im2row lanes built in the wrapper): ONE (M, 3*W*Cin) @ (3*W*Cin,
    # W*2C) matmul.  Bias + ReLU in f32, then zero the inter-image halo rows.
    b12 = jnp.dot(x_ref[0], m12_ref[...], preferred_element_type=jnp.float32)
    b12 = jnp.maximum(b12 + c12_ref[...], 0.0) * mask        # (M, W*2C) f32

    # Row-shifted copies (shared by the 5x5 conv and the final 3x3 conv).
    b12_sh = {d: _shift_rows(b12, d).astype(jnp.bfloat16) for d in (-2, -1, 0, 1, 2)}

    # bsum = b1 + b2 in packed (M, W*C) layout via a 0/1 selection matmul
    # (needed only for the final residual).
    bsum = jnp.dot(b12_sh[0], ssum_ref[...], preferred_element_type=jnp.float32)

    # branch_3_1: 5x5 conv as 5 banded matmuls (sum of dots -> MXU accumulation).
    acc31 = None
    for ki in range(5):
        t = jnp.dot(b12_sh[ki - 2], m31_ref[ki], preferred_element_type=jnp.float32)
        acc31 = t if acc31 is None else acc31 + t
    b31 = jnp.maximum(acc31 + c31_ref[...], 0.0) * mask      # (M, W*C) f32
    b31_sh = {d: _shift_rows(b31, d).astype(jnp.bfloat16) for d in (-1, 0, 1)}

    # branch_3_2: 3x3 conv; contributions from b3_1 and from [b1|b2] (the 4C
    # channel concat of the PyTorch module is folded into the weights host-side).
    acc32 = None
    for ki in range(3):
        t = (jnp.dot(b31_sh[ki - 1], m32a_ref[ki], preferred_element_type=jnp.float32)
             + jnp.dot(b12_sh[ki - 1], m32b_ref[ki], preferred_element_type=jnp.float32))
        acc32 = t if acc32 is None else acc32 + t
    b32 = jnp.maximum(acc32 + c32_ref[...], 0.0)

    # Residual b3_2 + b1 + b2.  Halo rows are garbage and are sliced off in the
    # wrapper; the output block is lane-dense (last dim = W*Cout).
    out_ref[0] = (b32 + bsum).astype(out_ref.dtype)


# ------------------------------- wrapper ----------------------------------

def _full_spec(a):
    nd = a.ndim
    return pl.BlockSpec(a.shape, lambda b, _nd=nd: (0,) * _nd)


def mbim_forward(x_nchw, Q, num_blocks=None):
    """x_nchw: (B, Cin, H, W) f32.  Q: prepared params from prepare_params()."""
    B, Cin, H, W = x_nchw.shape
    Cout = Q["c32"].shape[-1] // W

    if num_blocks is None:
        # v7x (2 TensorCores): prefer an even grid once the batch is big enough to
        # keep M large per step; on single-TC v5e/v6e one big slab maximises M.
        num_blocks = 2 if (B % 2 == 0 and B >= 8) else 1
    assert B % num_blocks == 0
    Bblk = B // num_blocks
    Hp = H + 4                              # 2 zero halo rows top + bottom per image
    Mb_raw = Bblk * Hp
    Mb = -(-Mb_raw // 8) * 8                # round sublane dim up to a multiple of 8

    # NCHW -> lane-packed rows (W*Cin on the lane axis), add per-image halos, build
    # the im2row lanes for the first 3x3 conv, stack Bblk images per grid block.
    x = jnp.transpose(x_nchw, (0, 2, 3, 1)).reshape(B, H, W * Cin)
    xp = jnp.pad(x, ((0, 0), (3, 3), (0, 0)))          # 2 halo rows + 1 im2row pad
    x_i2r = jnp.concatenate([xp[:, d:d + Hp, :] for d in range(3)], axis=-1)
    x_slab = x_i2r.reshape(num_blocks, Mb_raw, 3 * W * Cin)
    x_slab = jnp.pad(x_slab, ((0, 0), (0, Mb - Mb_raw), (0, 0))).astype(jnp.bfloat16)

    # Row-validity mask (1 for real image rows, 0 for halo / padding rows).
    rows = np.arange(Mb)
    rel = rows % Hp
    valid = (rel >= 2) & (rel < 2 + H) & (rows < Mb_raw)
    mask = jnp.asarray(valid.astype(np.float32)[:, None])          # (Mb, 1)

    flat = [Q["m12"], Q["c12"], Q["m31"], Q["c31"],
            Q["m32a"], Q["m32b"], Q["c32"], Q["ssum"]]

    out = pl.pallas_call(
        mbim_kernel,
        out_shape=jax.ShapeDtypeStruct((num_blocks, Mb, W * Cout), jnp.float32),
        grid=(num_blocks,),
        in_specs=[pl.BlockSpec((1, Mb, 3 * W * Cin), lambda b: (b, 0, 0)),
                  _full_spec(mask)]
                 + [_full_spec(a) for a in flat],
        out_specs=pl.BlockSpec((1, Mb, W * Cout), lambda b: (b, 0, 0)),
        compiler_params=pltpu.CompilerParams(
            dimension_semantics=("parallel",)),
    )(x_slab, mask, *flat)

    out = out[:, :Mb_raw, :].reshape(B, Hp, W, Cout)[:, 2:2 + H]
    return jnp.transpose(out, (0, 3, 1, 2))                        # -> NCHW


# ------------------------ host-side weight folding -------------------------

def _band_matrices(w_hwio, wdim, pad):
    """Per-kernel-row banded matrices: (K, wdim*cin, wdim*cout) (numpy, f32)."""
    w = np.asarray(w_hwio, np.float32)
    K, _, cin, cout = w.shape
    M = np.zeros((K, wdim * cin, wdim * cout), np.float32)
    for ki in range(K):
        for wo in range(wdim):
            for kj in range(K):
                wi = wo + kj - pad
                if 0 <= wi < wdim:
                    M[ki, wi * cin:(wi + 1) * cin,
                      wo * cout:(wo + 1) * cout] = w[ki, kj]
    return M


def prepare_params(P, wdim, wdtype=jnp.bfloat16):
    """BN-scale fold, branch-1/2 fusion, concat linearity folds, banded matrices.

    NOTE(VMEM): the band matrices grow as (W*C)^2; at large W*Cout tile the W axis
    (only a (2*pad+1)-block band is nonzero) or keep them in HBM (pl.ANY).
    """
    def fold(w, s):
        return (np.asarray(w, np.float32)
                * np.asarray(s, np.float32).reshape(1, 1, 1, -1))

    cout = np.asarray(P["w1"]).shape[-1]

    w1f, w2f = fold(P["w1"], P["s1"]), fold(P["w2"], P["s2"])
    w12 = np.concatenate([w1f, w2f], axis=3)                        # (3,3,Cin,2C)
    bias12 = np.concatenate([np.asarray(P["b1"]).reshape(-1),
                             np.asarray(P["b2"]).reshape(-1)])

    w31f = fold(P["w31"], P["s31"])                                 # (5,5,3C,C)
    w31_eff = np.concatenate(
        [w31f[:, :, :cout] + w31f[:, :, cout:2 * cout],
         w31f[:, :, :cout] + w31f[:, :, 2 * cout:]], axis=2)        # (5,5,2C,C)

    w32f = fold(P["w32"], P["s32"])                                 # (3,3,4C,C)
    w32_b31 = w32f[:, :, :cout]
    w32_b12 = np.concatenate(
        [w32f[:, :, cout:2 * cout] + w32f[:, :, 2 * cout:3 * cout],
         w32f[:, :, cout:2 * cout] + w32f[:, :, 3 * cout:]], axis=2)

    # 0/1 selection matrix: bsum_packed = b12_packed @ ssum
    ssum = np.zeros((wdim * 2 * cout, wdim * cout), np.float32)
    for wo in range(wdim):
        for c in range(cout):
            ssum[wo * 2 * cout + c, wo * cout + c] = 1.0
            ssum[wo * 2 * cout + cout + c, wo * cout + c] = 1.0

    # First conv: im2row-folded single (3*W*Cin, W*2C) matrix; row order matches
    # the wrapper's [row r-1 | row r | row r+1] lane concat.
    cin = w12.shape[2]
    m12 = _band_matrices(w12, wdim, 1).reshape(3 * wdim * cin, wdim * 2 * cout)

    def tile_bias(b):
        return jnp.asarray(
            np.tile(np.asarray(b, np.float32).reshape(-1), wdim)[None, :])

    return {
        "m12": jnp.asarray(m12, wdtype),
        "c12": tile_bias(bias12),
        "m31": jnp.asarray(_band_matrices(w31_eff, wdim, 2), wdtype),
        "c31": tile_bias(P["b31"]),
        "m32a": jnp.asarray(_band_matrices(w32_b31, wdim, 1), wdtype),
        "m32b": jnp.asarray(_band_matrices(w32_b12, wdim, 1), wdtype),
        "c32": tile_bias(P["b32"]),
        "ssum": jnp.asarray(ssum, wdtype),
    }


# -------------------- deterministic parameter init -------------------------

def init_params(key, cin, cout, eps=1e-5):
    keys = iter(jax.random.split(key, 24))

    def conv_w(kh, kw, ci, co):
        return 0.1 * jax.random.normal(next(keys), (kh, kw, ci, co), jnp.float32)

    def bn_fold(c):
        gamma = 1.0 + 0.1 * jax.random.normal(next(keys), (c,), jnp.float32)
        beta = 0.1 * jax.random.normal(next(keys), (c,), jnp.float32)
        mean = 0.05 * jax.random.normal(next(keys), (c,), jnp.float32)
        var = 1.0 + 0.1 * jnp.abs(jax.random.normal(next(keys), (c,), jnp.float32))
        scale = gamma / jnp.sqrt(var + eps)
        bias = beta - mean * scale
        return scale.reshape(1, c), bias.reshape(1, c)

    P = {}
    P["w1"] = conv_w(3, 3, cin, cout);            P["s1"], P["b1"] = bn_fold(cout)
    P["w2"] = conv_w(3, 3, cin, cout);            P["s2"], P["b2"] = bn_fold(cout)
    P["w31"] = conv_w(5, 5, 3 * cout, cout);      P["s31"], P["b31"] = bn_fold(cout)
    P["w32"] = conv_w(3, 3, 4 * cout, cout);      P["s32"], P["b32"] = bn_fold(cout)
    return P


# ----------------------- pure-JAX reference check ---------------------------

def mbim_reference(x_nchw, P):
    x = jnp.transpose(x_nchw, (0, 2, 3, 1))

    def cbr(z, w, s, b, pad):
        y = jax.lax.conv_general_dilated(
            z, w, window_strides=(1, 1), padding=((pad, pad), (pad, pad)),
            dimension_numbers=("NHWC", "HWIO", "NHWC"))
        y = y * s.reshape(1, 1, 1, -1) + b.reshape(1, 1, 1, -1)
        return jnp.maximum(y, 0.0)

    b1 = cbr(x, P["w1"], P["s1"], P["b1"], 1)
    b2 = cbr(x, P["w2"], P["s2"], P["b2"], 1)
    bsum = b1 + b2
    bc = jnp.concatenate([b1, b2], axis=-1)
    b31 = cbr(jnp.concatenate([bsum, bc], -1), P["w31"], P["s31"], P["b31"], 2)
    b32 = cbr(jnp.concatenate([b31, bsum, bc], -1), P["w32"], P["s32"], P["b32"], 1)
    return jnp.transpose(b32 + bsum, (0, 3, 1, 2))


# ---------------------------------- main ------------------------------------

if __name__ == "__main__":
    B, Cin, Cout, H, W = 2, 4, 8, 16, 16
    key = jax.random.PRNGKey(0)
    kx, kp = jax.random.split(key)
    x = jax.random.normal(kx, (B, Cin, H, W), jnp.float32)      # NCHW like PyTorch
    params = init_params(kp, Cin, Cout)
    prepped = prepare_params(params, W)

    out = jax.block_until_ready(mbim_forward(x, prepped))
    assert out.shape == (B, Cout, H, W), out.shape

    ref = jax.block_until_ready(mbim_reference(x, params))
    # bf16 matmuls (weights + LHS activations) -> looser tolerance than the f32 run.
    np.testing.assert_allclose(np.asarray(out), np.asarray(ref),
                               rtol=5e-2, atol=8e-2)
    print("KERNEL_OK")
</pallas_src>

<mosaic_0001>
module attributes {stable_mosaic.version = 11 : i64} {
  func.func @mbim_kernel(%arg0: i32, %arg1: memref<1x40x192xbf16, #tpu.memory_space<vmem>>, %arg2: memref<40x1xf32, #tpu.memory_space<vmem>>, %arg3: memref<192x256xbf16, #tpu.memory_space<vmem>>, %arg4: memref<1x256xf32, #tpu.memory_space<vmem>>, %arg5: memref<5x256x128xbf16, #tpu.memory_space<vmem>>, %arg6: memref<1x128xf32, #tpu.memory_space<vmem>>, %arg7: memref<3x128x128xbf16, #tpu.memory_space<vmem>>, %arg8: memref<3x256x128xbf16, #tpu.memory_space<vmem>>, %arg9: memref<1x128xf32, #tpu.memory_space<vmem>>, %arg10: memref<256x128xbf16, #tpu.memory_space<vmem>>, %arg11: memref<1x40x128xf32, #tpu.memory_space<vmem>>) attributes {dimension_semantics = [#tpu.dimension_semantics<parallel>], iteration_bounds = array<i64: 1>, scalar_prefetch = 0 : i64, scratch_operands = 0 : i64, tpu.core_type = #tpu.core_type<tc>, window_params = [{transform_indices = @transform_0, window_bounds = array<i64: 1, 40, 192>}, {pipeline_mode = #tpu.pipeline_mode<synchronous>, transform_indices = @transform_1, window_bounds = array<i64: 40, 1>}, {pipeline_mode = #tpu.pipeline_mode<synchronous>, transform_indices = @transform_2, window_bounds = array<i64: 192, 256>}, {pipeline_mode = #tpu.pipeline_mode<synchronous>, transform_indices = @transform_3, window_bounds = array<i64: 1, 256>}, {pipeline_mode = #tpu.pipeline_mode<synchronous>, transform_indices = @transform_4, window_bounds = array<i64: 5, 256, 128>}, {pipeline_mode = #tpu.pipeline_mode<synchronous>, transform_indices = @transform_5, window_bounds = array<i64: 1, 128>}, {pipeline_mode = #tpu.pipeline_mode<synchronous>, transform_indices = @transform_6, window_bounds = array<i64: 3, 128, 128>}, {pipeline_mode = #tpu.pipeline_mode<synchronous>, transform_indices = @transform_7, window_bounds = array<i64: 3, 256, 128>}, {pipeline_mode = #tpu.pipeline_mode<synchronous>, transform_indices = @transform_8, window_bounds = array<i64: 1, 128>}, {pipeline_mode = #tpu.pipeline_mode<synchronous>, transform_indices = @transform_9, window_bounds = array<i64: 256, 128>}, {transform_indices = @transform_10, window_bounds = array<i64: 1, 40, 128>}]} {
    %c0 = arith.constant 0 : index
    %c0_0 = arith.constant 0 : index
    %0 = vector.load %arg2[%c0, %c0_0] : memref<40x1xf32, #tpu.memory_space<vmem>>, vector<40x1xf32>
    %c0_1 = arith.constant 0 : index
    %c0_2 = arith.constant 0 : index
    %c0_3 = arith.constant 0 : index
    %1 = vector.load %arg1[%c0_1, %c0_2, %c0_3] : memref<1x40x192xbf16, #tpu.memory_space<vmem>>, vector<1x40x192xbf16>
    %2 = vector.shape_cast %1 : vector<1x40x192xbf16> to vector<40x192xbf16>
    %c0_4 = arith.constant 0 : index
    %c0_5 = arith.constant 0 : index
    %3 = vector.load %arg3[%c0_4, %c0_5] : memref<192x256xbf16, #tpu.memory_space<vmem>>, vector<192x256xbf16>
    %cst = arith.constant dense<0.000000e+00> : vector<40x256xf32>
    %4 = tpu.matmul %2, %3, %cst {dimension_numbers = #tpu.dot_dimension_numbers<[1], [0], [0], [1], [0, 0, 1, 1], [], []>} : vector<40x192xbf16>, vector<192x256xbf16>, vector<40x256xf32> -> vector<40x256xf32>
    %c0_6 = arith.constant 0 : index
    %c0_7 = arith.constant 0 : index
    %5 = vector.load %arg4[%c0_6, %c0_7] : memref<1x256xf32, #tpu.memory_space<vmem>>, vector<1x256xf32>
    %6 = vector.broadcast %5 : vector<1x256xf32> to vector<40x256xf32>
    %7 = arith.addf %4, %6 : vector<40x256xf32>
    %cst_8 = arith.constant 0.000000e+00 : f32
    %8 = vector.broadcast %cst_8 : f32 to vector<40x256xf32>
    %9 = arith.maximumf %7, %8 : vector<40x256xf32>
    %10 = vector.broadcast %0 : vector<40x1xf32> to vector<40x256xf32>
    %11 = arith.mulf %9, %10 : vector<40x256xf32>
    %c2_i32 = arith.constant 2 : i32
    %12 = tpu.dynamic_rotate %11 by %c2_i32 dim 0 : vector<40x256xf32>, i32 -> vector<40x256xf32>
    %13 = arith.truncf %12 : vector<40x256xf32> to vector<40x256xbf16>
    %c1_i32 = arith.constant 1 : i32
    %14 = tpu.dynamic_rotate %11 by %c1_i32 dim 0 : vector<40x256xf32>, i32 -> vector<40x256xf32>
    %15 = arith.truncf %14 : vector<40x256xf32> to vector<40x256xbf16>
    %16 = arith.truncf %11 : vector<40x256xf32> to vector<40x256xbf16>
    %c39_i32 = arith.constant 39 : i32
    %17 = tpu.dynamic_rotate %11 by %c39_i32 dim 0 : vector<40x256xf32>, i32 -> vector<40x256xf32>
    %18 = arith.truncf %17 : vector<40x256xf32> to vector<40x256xbf16>
    %c38_i32 = arith.constant 38 : i32
    %19 = tpu.dynamic_rotate %11 by %c38_i32 dim 0 : vector<40x256xf32>, i32 -> vector<40x256xf32>
    %20 = arith.truncf %19 : vector<40x256xf32> to vector<40x256xbf16>
    %c0_9 = arith.constant 0 : index
    %c0_10 = arith.constant 0 : index
    %21 = vector.load %arg10[%c0_9, %c0_10] : memref<256x128xbf16, #tpu.memory_space<vmem>>, vector<256x128xbf16>
    %cst_11 = arith.constant dense<0.000000e+00> : vector<40x128xf32>
    %22 = tpu.matmul %16, %21, %cst_11 {dimension_numbers = #tpu.dot_dimension_numbers<[1], [0], [0], [1], [0, 0, 1, 1], [], []>} : vector<40x256xbf16>, vector<256x128xbf16>, vector<40x128xf32> -> vector<40x128xf32>
    %c0_12 = arith.constant 0 : index
    %c0_13 = arith.constant 0 : index
    %c0_14 = arith.constant 0 : index
    %23 = vector.load %arg5[%c0_12, %c0_13, %c0_14] : memref<5x256x128xbf16, #tpu.memory_space<vmem>>, vector<1x256x128xbf16>
    %24 = vector.shape_cast %23 : vector<1x256x128xbf16> to vector<256x128xbf16>
    %cst_15 = arith.constant dense<0.000000e+00> : vector<40x128xf32>
    %25 = tpu.matmul %13, %24, %cst_15 {dimension_numbers = #tpu.dot_dimension_numbers<[1], [0], [0], [1], [0, 0, 1, 1], [], []>} : vector<40x256xbf16>, vector<256x128xbf16>, vector<40x128xf32> -> vector<40x128xf32>
    %c1 = arith.constant 1 : index
    %c0_16 = arith.constant 0 : index
    %c0_17 = arith.constant 0 : index
    %26 = vector.load %arg5[%c1, %c0_16, %c0_17] : memref<5x256x128xbf16, #tpu.memory_space<vmem>>, vector<1x256x128xbf16>
    %27 = vector.shape_cast %26 : vector<1x256x128xbf16> to vector<256x128xbf16>
    %cst_18 = arith.constant dense<0.000000e+00> : vector<40x128xf32>
    %28 = tpu.matmul %15, %27, %cst_18 {dimension_numbers = #tpu.dot_dimension_numbers<[1], [0], [0], [1], [0, 0, 1, 1], [], []>} : vector<40x256xbf16>, vector<256x128xbf16>, vector<40x128xf32> -> vector<40x128xf32>
    %29 = arith.addf %25, %28 : vector<40x128xf32>
    %c2 = arith.constant 2 : index
    %c0_19 = arith.constant 0 : index
    %c0_20 = arith.constant 0 : index
    %30 = vector.load %arg5[%c2, %c0_19, %c0_20] : memref<5x256x128xbf16, #tpu.memory_space<vmem>>, vector<1x256x128xbf16>
    %31 = vector.shape_cast %30 : vector<1x256x128xbf16> to vector<256x128xbf16>
    %cst_21 = arith.constant dense<0.000000e+00> : vector<40x128xf32>
    %32 = tpu.matmul %16, %31, %cst_21 {dimension_numbers = #tpu.dot_dimension_numbers<[1], [0], [0], [1], [0, 0, 1, 1], [], []>} : vector<40x256xbf16>, vector<256x128xbf16>, vector<40x128xf32> -> vector<40x128xf32>
    %33 = arith.addf %29, %32 : vector<40x128xf32>
    %c3 = arith.constant 3 : index
    %c0_22 = arith.constant 0 : index
    %c0_23 = arith.constant 0 : index
    %34 = vector.load %arg5[%c3, %c0_22, %c0_23] : memref<5x256x128xbf16, #tpu.memory_space<vmem>>, vector<1x256x128xbf16>
    %35 = vector.shape_cast %34 : vector<1x256x128xbf16> to vector<256x128xbf16>
    %cst_24 = arith.constant dense<0.000000e+00> : vector<40x128xf32>
    %36 = tpu.matmul %18, %35, %cst_24 {dimension_numbers = #tpu.dot_dimension_numbers<[1], [0], [0], [1], [0, 0, 1, 1], [], []>} : vector<40x256xbf16>, vector<256x128xbf16>, vector<40x128xf32> -> vector<40x128xf32>
    %37 = arith.addf %33, %36 : vector<40x128xf32>
    %c4 = arith.constant 4 : index
    %c0_25 = arith.constant 0 : index
    %c0_26 = arith.constant 0 : index
    %38 = vector.load %arg5[%c4, %c0_25, %c0_26] : memref<5x256x128xbf16, #tpu.memory_space<vmem>>, vector<1x256x128xbf16>
    %39 = vector.shape_cast %38 : vector<1x256x128xbf16> to vector<256x128xbf16>
    %cst_27 = arith.constant dense<0.000000e+00> : vector<40x128xf32>
    %40 = tpu.matmul %20, %39, %cst_27 {dimension_numbers = #tpu.dot_dimension_numbers<[1], [0], [0], [1], [0, 0, 1, 1], [], []>} : vector<40x256xbf16>, vector<256x128xbf16>, vector<40x128xf32> -> vector<40x128xf32>
    %41 = arith.addf %37, %40 : vector<40x128xf32>
    %c0_28 = arith.constant 0 : index
    %c0_29 = arith.constant 0 : index
    %42 = vector.load %arg6[%c0_28, %c0_29] : memref<1x128xf32, #tpu.memory_space<vmem>>, vector<1x128xf32>
    %43 = vector.broadcast %42 : vector<1x128xf32> to vector<40x128xf32>
    %44 = arith.addf %41, %43 : vector<40x128xf32>
    %cst_30 = arith.constant 0.000000e+00 : f32
    %45 = vector.broadcast %cst_30 : f32 to vector<40x128xf32>
    %46 = arith.maximumf %44, %45 : vector<40x128xf32>
    %47 = vector.broadcast %0 : vector<40x1xf32> to vector<40x128xf32>
    %48 = arith.mulf %46, %47 : vector<40x128xf32>
    %c1_i32_31 = arith.constant 1 : i32
    %49 = tpu.dynamic_rotate %48 by %c1_i32_31 dim 0 : vector<40x128xf32>, i32 -> vector<40x128xf32>
    %50 = arith.truncf %49 : vector<40x128xf32> to vector<40x128xbf16>
    %51 = arith.truncf %48 : vector<40x128xf32> to vector<40x128xbf16>
    %c39_i32_32 = arith.constant 39 : i32
    %52 = tpu.dynamic_rotate %48 by %c39_i32_32 dim 0 : vector<40x128xf32>, i32 -> vector<40x128xf32>
    %53 = arith.truncf %52 : vector<40x128xf32> to vector<40x128xbf16>
    %c0_33 = arith.constant 0 : index
    %c0_34 = arith.constant 0 : index
    %c0_35 = arith.constant 0 : index
    %54 = vector.load %arg7[%c0_33, %c0_34, %c0_35] : memref<3x128x128xbf16, #tpu.memory_space<vmem>>, vector<1x128x128xbf16>
    %55 = vector.shape_cast %54 : vector<1x128x128xbf16> to vector<128x128xbf16>
    %cst_36 = arith.constant dense<0.000000e+00> : vector<40x128xf32>
    %56 = tpu.matmul %50, %55, %cst_36 {dimension_numbers = #tpu.dot_dimension_numbers<[1], [0], [0], [1], [0, 0, 1, 1], [], []>} : vector<40x128xbf16>, vector<128x128xbf16>, vector<40x128xf32> -> vector<40x128xf32>
    %c0_37 = arith.constant 0 : index
    %c0_38 = arith.constant 0 : index
    %c0_39 = arith.constant 0 : index
    %57 = vector.load %arg8[%c0_37, %c0_38, %c0_39] : memref<3x256x128xbf16, #tpu.memory_space<vmem>>, vector<1x256x128xbf16>
    %58 = vector.shape_cast %57 : vector<1x256x128xbf16> to vector<256x128xbf16>
    %cst_40 = arith.constant dense<0.000000e+00> : vector<40x128xf32>
    %59 = tpu.matmul %15, %58, %cst_40 {dimension_numbers = #tpu.dot_dimension_numbers<[1], [0], [0], [1], [0, 0, 1, 1], [], []>} : vector<40x256xbf16>, vector<256x128xbf16>, vector<40x128xf32> -> vector<40x128xf32>
    %60 = arith.addf %56, %59 : vector<40x128xf32>
    %c1_41 = arith.constant 1 : index
    %c0_42 = arith.constant 0 : index
    %c0_43 = arith.constant 0 : index
    %61 = vector.load %arg7[%c1_41, %c0_42, %c0_43] : memref<3x128x128xbf16, #tpu.memory_space<vmem>>, vector<1x128x128xbf16>
    %62 = vector.shape_cast %61 : vector<1x128x128xbf16> to vector<128x128xbf16>
    %cst_44 = arith.constant dense<0.000000e+00> : vector<40x128xf32>
    %63 = tpu.matmul %51, %62, %cst_44 {dimension_numbers = #tpu.dot_dimension_numbers<[1], [0], [0], [1], [0, 0, 1, 1], [], []>} : vector<40x128xbf16>, vector<128x128xbf16>, vector<40x128xf32> -> vector<40x128xf32>
    %c1_45 = arith.constant 1 : index
    %c0_46 = arith.constant 0 : index
    %c0_47 = arith.constant 0 : index
    %64 = vector.load %arg8[%c1_45, %c0_46, %c0_47] : memref<3x256x128xbf16, #tpu.memory_space<vmem>>, vector<1x256x128xbf16>
    %65 = vector.shape_cast %64 : vector<1x256x128xbf16> to vector<256x128xbf16>
    %cst_48 = arith.constant dense<0.000000e+00> : vector<40x128xf32>
    %66 = tpu.matmul %16, %65, %cst_48 {dimension_numbers = #tpu.dot_dimension_numbers<[1], [0], [0], [1], [0, 0, 1, 1], [], []>} : vector<40x256xbf16>, vector<256x128xbf16>, vector<40x128xf32> -> vector<40x128xf32>
    %67 = arith.addf %63, %66 : vector<40x128xf32>
    %68 = arith.addf %60, %67 : vector<40x128xf32>
    %c2_49 = arith.constant 2 : index
    %c0_50 = arith.constant 0 : index
    %c0_51 = arith.constant 0 : index
    %69 = vector.load %arg7[%c2_49, %c0_50, %c0_51] : memref<3x128x128xbf16, #tpu.memory_space<vmem>>, vector<1x128x128xbf16>
    %70 = vector.shape_cast %69 : vector<1x128x128xbf16> to vector<128x128xbf16>
    %cst_52 = arith.constant dense<0.000000e+00> : vector<40x128xf32>
    %71 = tpu.matmul %53, %70, %cst_52 {dimension_numbers = #tpu.dot_dimension_numbers<[1], [0], [0], [1], [0, 0, 1, 1], [], []>} : vector<40x128xbf16>, vector<128x128xbf16>, vector<40x128xf32> -> vector<40x128xf32>
    %c2_53 = arith.constant 2 : index
    %c0_54 = arith.constant 0 : index
    %c0_55 = arith.constant 0 : index
    %72 = vector.load %arg8[%c2_53, %c0_54, %c0_55] : memref<3x256x128xbf16, #tpu.memory_space<vmem>>, vector<1x256x128xbf16>
    %73 = vector.shape_cast %72 : vector<1x256x128xbf16> to vector<256x128xbf16>
    %cst_56 = arith.constant dense<0.000000e+00> : vector<40x128xf32>
    %74 = tpu.matmul %18, %73, %cst_56 {dimension_numbers = #tpu.dot_dimension_numbers<[1], [0], [0], [1], [0, 0, 1, 1], [], []>} : vector<40x256xbf16>, vector<256x128xbf16>, vector<40x128xf32> -> vector<40x128xf32>
    %75 = arith.addf %71, %74 : vector<40x128xf32>
    %76 = arith.addf %68, %75 : vector<40x128xf32>
    %c0_57 = arith.constant 0 : index
    %c0_58 = arith.constant 0 : index
    %77 = vector.load %arg9[%c0_57, %c0_58] : memref<1x128xf32, #tpu.memory_space<vmem>>, vector<1x128xf32>
    %78 = vector.broadcast %77 : vector<1x128xf32> to vector<40x128xf32>
    %79 = arith.addf %76, %78 : vector<40x128xf32>
    %cst_59 = arith.constant 0.000000e+00 : f32
    %80 = vector.broadcast %cst_59 : f32 to vector<40x128xf32>
    %81 = arith.maximumf %79, %80 : vector<40x128xf32>
    %82 = arith.addf %81, %22 : vector<40x128xf32>
    %c0_60 = arith.constant 0 : index
    %c0_61 = arith.constant 0 : index
    %c0_62 = arith.constant 0 : index
    %83 = vector.load %arg11[%c0_60, %c0_61, %c0_62] : memref<1x40x128xf32, #tpu.memory_space<vmem>>, vector<1x40x128xf32>
    %84 = vector.shape_cast %83 : vector<1x40x128xf32> to vector<40x128xf32>
    %85 = vector.shape_cast %82 : vector<40x128xf32> to vector<1x40x128xf32>
    tpu.vector_store %arg11[%c0_60, %c0_61, %c0_62], %85 {strides = array<i32>} : memref<1x40x128xf32, #tpu.memory_space<vmem>>, vector<1x40x128xf32>,
    return
  }
  func.func @transform_0(%arg0: i32) -> (i32, i32, i32) {
    %c0_i32 = arith.constant 0 : i32
    %c0_i32_0 = arith.constant 0 : i32
    %c0_i32_1 = arith.constant 0 : i32
    return %arg0, %c0_i32, %c0_i32_0 : i32, i32, i32
  }
  func.func @transform_1(%arg0: i32) -> (i32, i32) {
    %c0_i32 = arith.constant 0 : i32
    %c0_i32_0 = arith.constant 0 : i32
    %c0_i32_1 = arith.constant 0 : i32
    return %c0_i32, %c0_i32_0 : i32, i32
  }
  func.func @transform_2(%arg0: i32) -> (i32, i32) {
    %c0_i32 = arith.constant 0 : i32
    %c0_i32_0 = arith.constant 0 : i32
    %c0_i32_1 = arith.constant 0 : i32
    return %c0_i32, %c0_i32_0 : i32, i32
  }
  func.func @transform_3(%arg0: i32) -> (i32, i32) {
    %c0_i32 = arith.constant 0 : i32
    %c0_i32_0 = arith.constant 0 : i32
    %c0_i32_1 = arith.constant 0 : i32
    return %c0_i32, %c0_i32_0 : i32, i32
  }
  func.func @transform_4(%arg0: i32) -> (i32, i32, i32) {
    %c0_i32 = arith.constant 0 : i32
    %c0_i32_0 = arith.constant 0 : i32
    %c0_i32_1 = arith.constant 0 : i32
    %c0_i32_2 = arith.constant 0 : i32
    return %c0_i32, %c0_i32_0, %c0_i32_1 : i32, i32, i32
  }
  func.func @transform_5(%arg0: i32) -> (i32, i32) {
    %c0_i32 = arith.constant 0 : i32
    %c0_i32_0 = arith.constant 0 : i32
    %c0_i32_1 = arith.constant 0 : i32
    return %c0_i32, %c0_i32_0 : i32, i32
  }
  func.func @transform_6(%arg0: i32) -> (i32, i32, i32) {
    %c0_i32 = arith.constant 0 : i32
    %c0_i32_0 = arith.constant 0 : i32
    %c0_i32_1 = arith.constant 0 : i32
    %c0_i32_2 = arith.constant 0 : i32
    return %c0_i32, %c0_i32_0, %c0_i32_1 : i32, i32, i32
  }
  func.func @transform_7(%arg0: i32) -> (i32, i32, i32) {
    %c0_i32 = arith.constant 0 : i32
    %c0_i32_0 = arith.constant 0 : i32
    %c0_i32_1 = arith.constant 0 : i32
    %c0_i32_2 = arith.constant 0 : i32
    return %c0_i32, %c0_i32_0, %c0_i32_1 : i32, i32, i32
  }
  func.func @transform_8(%arg0: i32) -> (i32, i32) {
    %c0_i32 = arith.constant 0 : i32
    %c0_i32_0 = arith.constant 0 : i32
    %c0_i32_1 = arith.constant 0 : i32
    return %c0_i32, %c0_i32_0 : i32, i32
  }
  func.func @transform_9(%arg0: i32) -> (i32, i32) {
    %c0_i32 = arith.constant 0 : i32
    %c0_i32_0 = arith.constant 0 : i32
    %c0_i32_1 = arith.constant 0 : i32
    return %c0_i32, %c0_i32_0 : i32, i32
  }
  func.func @transform_10(%arg0: i32) -> (i32, i32, i32) {
    %c0_i32 = arith.constant 0 : i32
    %c0_i32_0 = arith.constant 0 : i32
    %c0_i32_1 = arith.constant 0 : i32
    return %arg0, %c0_i32, %c0_i32_0 : i32, i32, i32
  }
}

</mosaic_0001>

<bundles_post_ra>
// kernel: tpu_custom_call.1
= control target key start
LH: loop header
LB: loop body
LE: loop exit
PB: predicated region body
PF: predicated region fallthrough
CT: control target
= control target key end

     0   :  { %15 = vsyncpa [#allocation3], 0  ;;  %s4335_s0 = inlined_call_operand.vmem [shape: bf16[1,40,192], index: 0, kind: input, shape index: {}]   ;;  %s4336_s1 = inlined_call_operand.vmem [shape: f32[40,1], index: 1, kind: input, shape index: {}]   ;;  %s4337_s2 = inlined_call_operand.hbm [shape: bf16[192,256], index: 2, kind: input, shape index: {}]   ;;  %s4338_s3 = inlined_call_operand.vmem [shape: f32[1,256], index: 3, kind: input, shape index: {}]   ;;  %s4339_s4 = inlined_call_operand.hbm [shape: bf16[5,256,128], index: 4, kind: input, shape index: {}]   ;;  %s4340_s5 = inlined_call_operand.vmem [shape: f32[1,128], index: 5, kind: input, shape index: {}]   ;;  %s4341_s6 = inlined_call_operand.hbm [shape: bf16[3,128,128], index: 6, kind: input, shape index: {}]   ;;  %s4342_s7 = inlined_call_operand.hbm [shape: bf16[3,256,128], index: 7, kind: input, shape index: {}]   ;;  %s4343_s8 = inlined_call_operand.vmem [shape: f32[1,128], index: 8, kind: input, shape index: {}]   ;;  %s4344_s9 = inlined_call_operand.hbm [shape: bf16[256,128], index: 9, kind: input, shape index: {}]   ;;  %s4345_s10 = inlined_call_operand.hbm [shape: f32[1,40,128], index: 10, kind: output, shape index: {}]  }
   0x1   :  { %16 = vsyncpa [#allocation6], 0 }
   0x2   :  { %17 = vsyncpa [#allocation9], 0 }
   0x3   :  { %18 = vsyncpa [#allocation4], 0  ;;  %s3654_s13 = smov [#allocation5]  }
   0x4   :  { %s42_s14 = sshll.u32 %s3654_s13, 4  ;;  %s43_s14 = int_to_ptr.vmem [resolvable:$true] %s42_s14 }
   0x5   :  { %s3534_s15 = scalar_lea.vmem %s43_s14, 10240  ;;  %p3539_p1 = scmp.lt.s32.totalorder %s43_s14, %s43_s14 }
   0x6   :  { %p3535_p0 = scmp.ne.s32.totalorder %s43_s14, %s3534_s15  ;;  %p3540_p2 = scmp.lt.s32.totalorder %s3534_s15, %s3534_s15 }
   0x8   :  { %p3541_p3 = por %p3540_p2, %p3539_p1 }
   0xa   :  { %p3542_p4 = pnand %p3541_p3, %p3535_p0 }
   0xc   :  { %3545 = shalt.err (!%p3542_p4)
}
   0xd   :  { %s3655_s16 = smov 64   ;;  %s3656_s17 = smov 4  }
   0xe   :  { %48 = dma.hbm_to_vmem [thread:$0]  %s4339_s4, 10240, %s43_s14, [#allocation6], %s3655_s16, %s3655_s16, %s3656_s17  }
   0xf   :  { %s3657_s20 = smov [#allocation8]   ;;  %s3658_s22 = smov [#allocation2]  }
  0x10   :  { %s68_s21 = sshll.u32 %s3657_s20, 4  ;;  %s28_s23 = sshll.u32 %s3658_s22, 4  ;;  %s69_s21 = int_to_ptr.vmem [resolvable:$true] %s68_s21  ;;  %s29_s23 = int_to_ptr.vmem [resolvable:$true] %s28_s23 }
  0x11   :  { %s3554_s24 = scalar_lea.vmem %s69_s21, 6144  ;;  %p3559_p6 = scmp.lt.s32.totalorder %s69_s21, %s69_s21 }
  0x12   :  { %p3555_p5 = scmp.ne.s32.totalorder %s69_s21, %s3554_s24  ;;  %p3560_p7 = scmp.lt.s32.totalorder %s3554_s24, %s3554_s24 }
  0x14   :  { %p3561_p8 = por %p3560_p7, %p3559_p6 }
  0x16   :  { %p3562_p9 = pnand %p3561_p8, %p3555_p5 }
  0x18   :  { %3565 = shalt.err (!%p3562_p9)
}
  0x19   :  { %74 = dma.hbm_to_vmem [thread:$0]  %s4342_s7, 6144, %s69_s21, [#allocation9], %s3655_s16, %s3655_s16, %s3656_s17  }
  0x1a   :  { %s3574_s4 = scalar_lea.vmem %s29_s23, 3072  ;;  %p3579_p11 = scmp.lt.s32.totalorder %s29_s23, %s29_s23 }
  0x1b   :  { %p3575_p10 = scmp.ne.s32.totalorder %s29_s23, %s3574_s4  ;;  %p3580_p12 = scmp.lt.s32.totalorder %s3574_s4, %s3574_s4 }
  0x1d   :  { %p3581_p13 = por %p3580_p12, %p3579_p11 }
  0x1f   :  { %p3582_p0 = pnand %p3581_p13, %p3575_p10 }
  0x21   :  { %3585 = shalt.err (!%p3582_p0)
}
  0x22   :  { %s3659_s27 = smov 128   ;;  %s3660_s28 = smov 8  }
  0x23   :  { %34 = dma.hbm_to_vmem [thread:$0]  %s4337_s2, 3072, %s29_s23, [#allocation3], %s3659_s27, %s3659_s27, %s3660_s28  }
  0x24   :  { %s3661_s11 = smov [#allocation7]   ;;  %s3662_s7 = smov [#allocation10]  }
  0x25   :  { %s56_s12 = sshll.u32 %s3661_s11, 4  ;;  %s82_s13 = sshll.u32 %s3662_s7, 4  ;;  %s57_s12 = int_to_ptr.vmem [resolvable:$true] %s56_s12  ;;  %s83_s13 = int_to_ptr.vmem [resolvable:$true] %s82_s13 }
  0x26   :  { %s3594_s14 = scalar_lea.vmem %s57_s12, 3072  ;;  %p3599_p2 = scmp.lt.s32.totalorder %s57_s12, %s57_s12 }
  0x27   :  { %p3595_p1 = scmp.ne.s32.totalorder %s57_s12, %s3594_s14  ;;  %p3600_p3 = scmp.lt.s32.totalorder %s3594_s14, %s3594_s14 }
  0x29   :  { %p3601_p4 = por %p3600_p3, %p3599_p2 }
  0x2b   :  { %p3602_p5 = pnand %p3601_p4, %p3595_p1 }
  0x2d   :  { %3605 = shalt.err (!%p3602_p5)
}
  0x2e   :  { %62 = dma.hbm_to_vmem [thread:$0]  %s4341_s6, 3072, %s57_s12, [#allocation6], %s3655_s16, %s3655_s16, %s3656_s17  }
  0x2f   :  { %s3614_s2 = scalar_lea.vmem %s83_s13, 2048  ;;  %p3619_p7 = scmp.lt.s32.totalorder %s83_s13, %s83_s13 }
  0x30   :  { %p3615_p6 = scmp.ne.s32.totalorder %s83_s13, %s3614_s2  ;;  %p3620_p8 = scmp.lt.s32.totalorder %s3614_s2, %s3614_s2 }
  0x32   :  { %p3621_p9 = por %p3620_p8, %p3619_p7 }
  0x34   :  { %p3622_p10 = pnand %p3621_p9, %p3615_p6 }
  0x36   :  { %3625 = shalt.err (!%p3622_p10)
}
  0x37   :  { %88 = dma.hbm_to_vmem [thread:$0]  %s4344_s9, 2048, %s83_s13, [#allocation9], %s3655_s16, %s3655_s16, %s3656_s17  }
  0x38   :  { %3646 = dma.done.wait [#allocation3], 3072  }
  0x39   :  { %3647 = vsyncadd [#allocation3], 4294964224 }
  0x3a   :  { %3648 = dma.done.wait [#allocation6], 13312  }
  0x3b   :  { %3649 = vsyncadd [#allocation6], 4294953984 }
  0x3c   :  { %3650 = dma.done.wait [#allocation9], 8192  }
  0x3d   :  { %3651 = vsyncadd [#allocation9], 4294959104  ;;  %v3663_v0 = vmov 0   ;;  %v3314_v1 = vld [vmem:[#allocation2 + $0x74] ss:$8 sps:$4 sm:$0xff]   ;;  %vm295_vm0 = vcmask 523264  }
  0x3e   :  { %3312 = vset.pattern.permute.xlu0 %v3663_v0  ;;  %3313 = vset.pattern.permute.xlu1 %v3663_v0  ;;  %v3316_v2 = vld [vmem:[#allocation2 + $0x70] ss:$8 sps:$4 sm:$0xff]   ;;  %v3317_v3 = vld [vmem:[#allocation2 + $0x64] ss:$8 sps:$4 sm:$0xff]   ;;  %v3319_v4 = vld [vmem:[#allocation2 + $0x60] ss:$8 sps:$4 sm:$0xff]  }
  0x3f   :  { %305 = vmatprep.subr.bf16.mxu0 %v3314_v1  ;;  %v3320_v5 = vld [vmem:[#allocation2 + $0x54] ss:$8 sps:$4 sm:$0xff]   ;;  %v3322_v6 = vld [vmem:[#allocation2 + $0x50] ss:$8 sps:$4 sm:$0xff]   ;;  %v3323_v7 = vld [vmem:[#allocation2 + $0x44] ss:$8 sps:$4 sm:$0xff]  }
  0x40   :  { %306 = vmatpush1.bf16.msra.mxu0 %v3316_v2  ;;  %v3325_v8 = vld [vmem:[#allocation2 + $0x40] ss:$8 sps:$4 sm:$0xff]   ;;  %v3326_v9 = vld [vmem:[#allocation2 + $0x34] ss:$8 sps:$4 sm:$0xff]   ;;  %v3328_v10 = vld [vmem:[#allocation2 + $0x30] ss:$8 sps:$4 sm:$0xff]  }
  0x41   :  { %307 = vmatprep.subr.bf16.mxu0 %v3317_v3  ;;  %v3329_v11 = vld [vmem:[#allocation2 + $0x24] ss:$8 sps:$4 sm:$0xff]   ;;  %v3331_v13 = vld [vmem:[#allocation2 + $0x20] ss:$8 sps:$4 sm:$0xff]   ;;  %v3332_v14 = vld [vmem:[#allocation2 + $0x14] ss:$8 sps:$4 sm:$0xff]  }
  0x42   :  { %v3352_v12 = vld [vmem:[%s4335_s0 + $0x4] ss:$8 sps:$4 sm:$0xff]   ;;  %v107_v17 = vld [vmem:[%s4336_s1 + $0x10] sm:$0xff]  ;;  %v108_v18 = vld [vmem:[%s4336_s1 + $0x18] sm:$0xff]  ;;  %vm3665_vm5 = vmmov 0  }
  0x43   :  { %2703 = vmatprep.mubr.msk.bf16.mxu0 %vm295_vm0, %v3352_v12  ;;  %v105_v15 = vld [vmem:[%s4336_s1] sm:$0xff]  ;;  %v106_v16 = vld [vmem:[%s4336_s1 + $0x8] sm:$0xff]  ;;  %v3334_v19 = vld [vmem:[#allocation2 + $0x10] ss:$8 sps:$4 sm:$0xff]   ;;  %388 = vperm.xlu1 %3313, %v107_v17  }
  0x44   :  { %308 = vmatpush1.bf16.msra.mxu0 %v3319_v4  ;;  %378 = vperm.xlu0 %3312, %v105_v15   ;;  %v3358_v20 = vld [vmem:[#allocation10 + $0x78] sm:$0xff]   ;;  %v3335_v21 = vld [vmem:[#allocation2 + $0x4] ss:$8 sps:$4 sm:$0xff]   ;;  %v3360_v23 = vld [vmem:[#allocation10 + $0x70] sm:$0xff]  }
  0x45   :  { %309 = vmatprep.subr.bf16.mxu0 %v3320_v5  ;;  %v3359_v22 = vld [vmem:[#allocation10 + $0x38] sm:$0xff]   ;;  %2876 = vmatprep.subr.bf16.mxu1 %v3358_v20  ;;  %v109_v24 = vld [vmem:[%s4336_s1 + $0x20] sm:$0xff]  ;;  %v3361_v25 = vld [vmem:[#allocation10 + $0x30] sm:$0xff]  }
  0x46   :  { %2877 = vmatpush3.bf16.msra.mxu1 %v3359_v22  ;;  %v3362_v26 = vld [vmem:[#allocation10 + $0x68] sm:$0xff]   ;;  %v3338_v28 = vld [vmem:[#allocation2 + $0xb4] ss:$8 sps:$4 sm:$0xff]   ;;  %v3340_v29 = vld [vmem:[#allocation2 + $0xb0] ss:$8 sps:$4 sm:$0xff]  }
  0x47   :  { %393 = vperm.xlu1 %3313, %v108_v18   ;;  %2878 = vmatprep.subr.bf16.mxu1 %v3360_v23  ;;  %v3337_v27 = vld [vmem:[#allocation2] ss:$8 sps:$4 sm:$0xff]   ;;  %v3341_v32 = vld [vmem:[#allocation2 + $0xa4] ss:$8 sps:$4 sm:$0xff]   ;;  %v3367_v34 = vld [vmem:[#allocation10 + $0x58] sm:$0xff]  }
  0x48   :  { %310 = vmatpush1.bf16.msra.mxu0 %v3322_v6  ;;  %383 = vperm.xlu0 %3312, %v106_v16   ;;  %v3363_v30 = vld [vmem:[#allocation10 + $0x28] sm:$0xff]   ;;  %v3364_v31 = vld [vmem:[#allocation10 + $0x60] sm:$0xff]   ;;  %v3344_v36 = vld [vmem:[#allocation2 + $0x94] ss:$8 sps:$4 sm:$0xff]  }
  0x49   :  { %311 = vmatprep.subr.bf16.mxu0 %v3323_v7  ;;  %v3365_v33 = vld [vmem:[#allocation10 + $0x20] sm:$0xff]   ;;  %v3346_v37 = vld [vmem:[#allocation2 + $0x90] ss:$8 sps:$4 sm:$0xff]   ;;  %v3353_v42 = vld [vmem:[%s4335_s0 + $0x14] ss:$8 sps:$4 sm:$0xff]   ;;  %v141_v7 = vlaneseq }
  0x4a   :  { %2879 = vmatpush3.bf16.msra.mxu1 %v3361_v25  ;;  %v3343_v35 = vld [vmem:[#allocation2 + $0xa0] ss:$8 sps:$4 sm:$0xff]   ;;  %v3347_v38 = vld [vmem:[#allocation2 + $0x84] ss:$8 sps:$4 sm:$0xff]   ;;  %v3366_v40 = vld [vmem:[#allocation5 + $0x78] sm:$0xff]  }
  0x4b   :  { %2880 = vmatprep.subr.bf16.mxu1 %v3362_v26  ;;  %v3349_v39 = vld [vmem:[#allocation2 + $0x80] ss:$8 sps:$4 sm:$0xff]   ;;  %v3368_v43 = vld [vmem:[#allocation5 + $0x38] sm:$0xff]   ;;  %v3370_v49 = vld [vmem:[#allocation5 + $0x70] sm:$0xff]  }
  0x4c   :  { %312 = vmatpush1.bf16.msra.mxu0 %v3325_v8  ;;  %398 = vperm.xlu0 %3312, %v109_v24   ;;  %v3350_v41 = vld [vmem:[%s4335_s0] ss:$8 sps:$4 sm:$0xff]   ;;  %v3355_v45 = vld [vmem:[%s4335_s0 + $0x10] ss:$8 sps:$4 sm:$0xff]   ;;  %v3785_v8 = vshrl.u32 %v141_v7, 7 }
  0x4d   :  { %313 = vmatprep.subr.bf16.mxu0 %v3326_v9  ;;  %v114_v44 = vld [vmem:[%s4335_s0 + $0x20] sm:$0xff]  ;;  %v3369_v48 = vld [vmem:[#allocation10 + $0x18] sm:$0xff]   ;;  %v3371_v50 = vld [vmem:[#allocation10 + $0x50] sm:$0xff]  }
  0x4e   :  { %2881 = vmatpush3.bf16.msra.mxu1 %v3363_v30  ;;  %v2678_v46 = vcombine.high %v114_v44, %v114_v44  ;;  %v2677_v47 = vcombine.low %v114_v44, %v114_v44  ;;  %v3372_v51 = vld [vmem:[#allocation5 + $0x30] sm:$0xff]   ;;  %v3374_v53 = vld [vmem:[#allocation5 + $0x68] sm:$0xff]   ;;  %v3378_v57 = vld [vmem:[#allocation5 + $0x60] sm:$0xff]   ;;  %v147_v9 = vsub.s32 1, %v3785_v8  ;;  %vm423_vm1 = vcmp.lt.s32.totalorder %v3785_v8, 2 }
  0x4f   :  { %2882 = vmatprep.subr.bf16.mxu1 %v3364_v31  ;;  %v3373_v52 = vld [vmem:[#allocation10 + $0x10] sm:$0xff]   ;;  %v3375_v54 = vld [vmem:[#allocation10 + $0x48] sm:$0xff]   ;;  %v3379_v58 = vld [vmem:[#allocation10 + $0x40] sm:$0xff]   ;;  %vm450_vm2 = vcmp.lt.s32.totalorder %v3785_v8, 1  ;;  %vm510_vm3 = vcmp.lt.s32.totalorder %v3785_v8, 6  ;;  %vm483_vm4 = vcmp.lt.s32.totalorder %v3785_v8, 7 }
  0x50   :  { %314 = vmatpush1.bf16.msra.mxu0 %v3328_v10  ;;  %v3376_v55 = vld [vmem:[#allocation5 + $0x28] sm:$0xff]   ;;  %v3380_v59 = vld [vmem:[#allocation5 + $0x20] sm:$0xff]   ;;  %v3382_v61 = vld [vmem:[#allocation5 + $0x58] sm:$0xff]   ;;  %v143_v10 = vsub.s32 0, %v3785_v8 }
  0x51   :  { %315 = vmatprep.subr.bf16.mxu0 %v3329_v11  ;;  %v3377_v56 = vld [vmem:[#allocation10 + $0x8] sm:$0xff]   ;;  %v3381_v60 = vld [vmem:[#allocation10] sm:$0xff]   ;;  %v3383_v62 = vld [vmem:[#allocation5 + $0xf8] sm:$0xff]  }
  0x52   :  { %2883 = vmatpush3.bf16.msra.mxu1 %v3365_v33  ;;  %v3384_v63 = vld [vmem:[#allocation5 + $0x18] sm:$0xff]   ;;  %v3386_v0 = vld [vmem:[#allocation5 + $0x50] sm:$0xff]   ;;  %v3390_v2 = vld [vmem:[#allocation5 + $0x48] sm:$0xff]  }
  0x53   :  { %2884 = vmatprep.subr.bf16.mxu1 %v3367_v34  ;;  %v3388_v1 = vld [vmem:[#allocation5 + $0x10] sm:$0xff]   ;;  %v3392_v3 = vld [vmem:[#allocation5 + $0x8] sm:$0xff]   ;;  %v3394_v4 = vld [vmem:[#allocation5 + $0x40] sm:$0xff]  }
  0x54   :  { %316 = vmatpush1.bf16.msra.mxu0 %v3331_v13  ;;  %v3396_v5 = vld [vmem:[#allocation5] sm:$0xff]   ;;  %v3398_v6 = vld [vmem:[#allocation5 + $0x1f8] sm:$0xff]  }
  0x55   :  { %317 = vmatprep.subr.bf16.mxu0 %v3332_v14  ;;  %v139_v11 = vld [vmem:[%s4338_s3] sm:$0x3]  ;;  %v3385_v44 = vld [vmem:[#allocation5 + $0xb8] sm:$0xff]  }
  0x56   :  { %2885 = vmatpush3.bf16.msra.mxu1 %v3369_v48  ;;  %v148_v13 = vrot.slane %v139_v11, %v147_v9  ;;  %v144_v15 = vrot.slane %v139_v11, %v143_v10  ;;  %v3393_v10 = vld [vmem:[#allocation5 + $0xa8] sm:$0xff]   ;;  %v3513_v8 = vld [vmem:[#allocation7 + $0x60] sm:$0xff]  }
  0x57   :  { %2886 = vmatprep.subr.bf16.mxu1 %v3371_v50 }
  0x58   :  { %318 = vmatpush1.bf16.msra.mxu0 %v3334_v19 }
  0x59   :  { %319 = vmatprep.subr.bf16.mxu0 %v3335_v21 }
  0x5a   :  { %2887 = vmatpush3.bf16.msra.mxu1 %v3373_v52 }
  0x5b   :  { %2888 = vmatprep.subr.bf16.mxu1 %v3375_v54 }
  0x5c   :  { %320 = vmatpush1.bf16.msra.mxu0 %v3337_v27 }
  0x5d   :  { %329 = vmatprep.subr.bf16.mxu0 %v3338_v28 }
  0x5e   :  { %2889 = vmatpush3.bf16.msra.mxu1 %v3377_v56 }
  0x5f   :  { %2890 = vmatprep.subr.bf16.mxu1 %v3379_v58  ;;  %v3389_v58 = vld [vmem:[#allocation5 + $0xb0] sm:$0xff]  }
  0x60   :  { %330 = vmatpush2.bf16.msra.mxu0 %v3340_v29 }
  0x61   :  { %331 = vmatprep.subr.bf16.mxu0 %v3341_v32 }
  0x62   :  { %2891 = vmatpush3.bf16.msra.mxu1 %v3381_v60 }
  0x63   :  { %2910 = vmatprep.subr.bf16.mxu1 %v3383_v62 }
  0x64   :  { %332 = vmatpush2.bf16.msra.mxu0 %v3343_v35 }
  0x65   :  { %333 = vmatprep.subr.bf16.mxu0 %v3344_v36 }
  0x68   :  { %334 = vmatpush2.bf16.msra.mxu0 %v3346_v37 }
  0x69   :  { %335 = vmatprep.subr.bf16.mxu0 %v3347_v38 }
  0x6c   :  { %336 = vmatpush2.bf16.msra.mxu0 %v3349_v39 }
  0x6d   :  { %2944 = vmatprep.subr.bf16.mxu0 %v3366_v40 }
  0x6f   :  { %338 = vmatmul.mubr.bf16.vlgmr.msra.gmra.mxu0 %v3350_v41 }
  0x70   :  { %2704 = vmatprep.mubr.msk.bf16.mxu0 %vm295_vm0, %v3353_v42  ;;  %2945 = vmatpush3.bf16.msra.mxu0 %v3368_v43 }
  0x71   :  { %2946 = vmatprep.subr.bf16.mxu0 %v3370_v49  ;;  %v3387_v49 = vld [vmem:[#allocation5 + $0xf0] sm:$0xff]  }
  0x74   :  { %2947 = vmatpush3.bf16.msra.mxu0 %v3372_v51 }
  0x75   :  { %2948 = vmatprep.subr.bf16.mxu0 %v3374_v53 }
  0x77   :  { %348 = vmatmul.mubr.bf16.gmra.mxu0 %v3355_v45 }
  0x78   :  { %2705 = vmatprep.mubr.msk.bf16.mxu0 %vm295_vm0, %v2678_v46  ;;  %2949 = vmatpush3.bf16.msra.mxu0 %v3376_v55 }
  0x79   :  { %2950 = vmatprep.subr.bf16.mxu0 %v3378_v57 }
  0x7c   :  { %2951 = vmatpush3.bf16.msra.mxu0 %v3380_v59 }
  0x7d   :  { %2952 = vmatprep.subr.bf16.mxu0 %v3382_v61 }
  0x7f   :  { %358 = vmatmul.mubr.bf16.gmra.mxu0 %v2677_v47 }
  0x80   :  { %2953 = vmatpush3.bf16.msra.mxu0 %v3384_v63 }
  0x81   :  { %2954 = vmatprep.subr.bf16.mxu0 %v3386_v0  ;;  %v3391_v0 = vld [vmem:[#allocation5 + $0xe8] sm:$0xff]  }
  0x84   :  { %2955 = vmatpush3.bf16.msra.mxu0 %v3388_v1 }
  0x85   :  { %2956 = vmatprep.subr.bf16.mxu0 %v3390_v2 }
  0x88   :  { %2957 = vmatpush3.bf16.msra.mxu0 %v3392_v3 }
  0x89   :  { %2958 = vmatprep.subr.bf16.mxu0 %v3394_v4 }
  0x8c   :  { %2959 = vmatpush3.bf16.msra.mxu0 %v3396_v5 }
  0x8d   :  { %3012 = vmatprep.subr.bf16.mxu0 %v3398_v6 }
  0xbe   :  { %v3794_v29 = vpop.permute.xlu1 %388 }
  0xbf   :  { %v3792_v18 = vpop.permute.xlu0 %378 }
  0xc2   :  { %v3819_v51 = vpop.permute.xlu1 %393 }
  0xc3   :  { %v3796_v30 = vpop.permute.xlu0 %383 }
  0xc7   :  { %v3822_v55 = vpop.permute.xlu0 %398 }
 0x12f   :  { %v339_v12 = vpop.f32.mrf.mxu0 }
 0x130   :  { %v340_v21 = vadd.f32 %v339_v12, %v144_v15 }
 0x131   :  { %v341_v14 = vpop.f32.mrf.mxu0 }
 0x132   :  { %v342_v19 = vadd.f32 %v341_v14, %v148_v13  ;;  %v366_v28 = vmax.f32 %v340_v21, 0.0 }
 0x133   :  { %v343_v16 = vpop.f32.mrf.mxu0 }
 0x134   :  { %v344_v17 = vadd.f32 %v343_v16, %v144_v15  ;;  %v367_v25 = vmax.f32 %v342_v19, 0.0  ;;  %v3808_v39 = vmul.f32 %v3792_v18, %v366_v28  ;;  %v3399_v28 = vld [vmem:[#allocation5 + $0xd8] sm:$0xff]  }
 0x135   :  { %v345_v20 = vpop.f32.mrf.mxu0 }
 0x136   :  { %v346_v22 = vadd.f32 %v345_v20, %v148_v13  ;;  %v368_v24 = vmax.f32 %v344_v17, 0.0  ;;  %v3805_v37 = vmul.f32 %v3792_v18, %v367_v25  ;;  %v411_v7 = vrot.slane %v3808_v39, 6  ;;  %v3400_v25 = vld [vmem:[#allocation5 + $0x1b8] sm:$0xff]  }
 0x137   :  { %v349_v23 = vpop.f32.mrf.mxu0 }
 0x138   :  { %v369_v26 = vmax.f32 %v346_v22, 0.0  ;;  %v3799_v33 = vmul.f32 %v3796_v30, %v368_v24  ;;  %v350_v35 = vadd.f32 %v349_v23, %v144_v15  ;;  %v412_v14 = vrot.slane %v3805_v37, 6  ;;  %v3397_v22 = vld [vmem:[#allocation5 + $0xa0] sm:$0xff]  }
 0x139   :  { %v351_v27 = vpop.f32.mrf.mxu0 }
 0x13a   :  { %v352_v31 = vadd.f32 %v351_v27, %v148_v13  ;;  %v3802_v34 = vmul.f32 %v3796_v30, %v369_v26  ;;  %v370_v45 = vmax.f32 %v350_v35, 0.0  ;;  %v3816_v48 = vpack.c.bf16 %v3799_v33, %v3808_v39 }
 0x13b   :  { %v353_v32 = vpop.f32.mrf.mxu0  ;;  %v413_v9 = vrot.slane %v3799_v33, 6 }
 0x13c   :  { %v354_v36 = vadd.f32 %v353_v32, %v144_v15  ;;  %v371_v40 = vmax.f32 %v352_v31, 0.0  ;;  %v3812_v42 = vpack.c.bf16 %v3802_v34, %v3805_v37  ;;  %v3831_v60 = vmul.f32 %v3794_v29, %v370_v45 }
 0x13d   :  { %v355_v38 = vpop.f32.mrf.mxu0  ;;  %v414_v6 = vrot.slane %v3802_v34, 6  ;;  %v430_v24 = vsel %vm423_vm1, %v411_v7, %v413_v9  ;;  %v443_v27 = vrot.slane %v3802_v34, 7  ;;  %v441_v32 = vrot.slane %v3805_v37, 7 }
 0x13e   :  { %v356_v41 = vadd.f32 %v355_v38, %v148_v13  ;;  %v372_v46 = vmax.f32 %v354_v36, 0.0  ;;  %687 = vmatprep.mubr.bf16.mxu1 %v3812_v42  ;;  %v3825_v56 = vmul.f32 %v3794_v29, %v371_v40  ;;  %v504_v36 = vrot.slane %v3831_v60, 2  ;;  %v3402_v40 = vld [vmem:[#allocation5 + $0x1f0] sm:$0xff]  }
 0x13f   :  { %v359_v43 = vpop.f32.mrf.mxu0  ;;  %688 = vmatmul.mubr.bf16.vlgmr.msra.gmra.mxu1 %v3816_v48  ;;  %v431_v19 = vsel %vm423_vm1, %v412_v14, %v414_v6  ;;  %v502_v45 = vrot.slane %v3799_v33, 2 }
 0x140   :  { %v360_v47 = vadd.f32 %v359_v43, %v144_v15  ;;  %v373_v50 = vmax.f32 %v356_v41, 0.0  ;;  %2911 = vmatpush3.bf16.msra.mxu1 %v3385_v44  ;;  %v3837_v62 = vmul.f32 %v3819_v51, %v372_v46  ;;  %v416_v17 = vrot.slane %v3825_v56, 6  ;;  %v3401_v46 = vld [vmem:[#allocation5 + $0x98] sm:$0xff]  }
 0x141   :  { %v361_v52 = vpop.f32.mrf.mxu0  ;;  %2912 = vmatprep.subr.bf16.mxu1 %v3387_v49  ;;  %v415_v44 = vrot.slane %v3831_v60, 6 }
 0x142   :  { %v374_v53 = vmax.f32 %v360_v47, 0.0  ;;  %v362_v54 = vadd.f32 %v361_v52, %v148_v13  ;;  %v3828_v57 = vmul.f32 %v3819_v51, %v373_v50  ;;  %v3849_v5 = vpack.c.bf16 %v3837_v62, %v3831_v60  ;;  %v3395_v13 = vld [vmem:[#allocation5 + $0xe0] sm:$0xff]   ;;  %v3403_v50 = vld [vmem:[#allocation5 + $0xd0] sm:$0xff]  }
 0x143   :  { %v363_v59 = vpop.f32.mrf.mxu0  ;;  %v417_v35 = vrot.slane %v3837_v62, 6  ;;  %v429_v38 = vsel %vm423_vm1, %v414_v6, %v416_v17  ;;  %v458_v47 = vsel %vm450_vm2, %v441_v32, %v443_v27  ;;  %v3404_v52 = vld [vmem:[#allocation5 + $0x1b0] sm:$0xff]   ;;  %v500_v6 = vrot.slane %v3808_v39, 2 }
 0x144   :  { %v3834_v61 = vmul.f32 %v3822_v55, %v374_v53  ;;  %v375_v63 = vmax.f32 %v362_v54, 0.0  ;;  %v3841_v1 = vpack.c.bf16 %v3828_v57, %v3825_v56  ;;  %2913 = vmatpush3.bf16.msra.mxu1 %v3389_v58  ;;  %v418_v11 = vrot.slane %v3828_v57, 6 }
 0x145   :  { %v364_v2 = vpop.f32.mrf.mxu0  ;;  %2914 = vmatprep.subr.bf16.mxu1 %v3391_v0  ;;  %v426_v53 = vsel %vm423_vm1, %v415_v44, %v417_v35  ;;  %v503_v54 = vrot.slane %v3802_v34, 2  ;;  %v505_v58 = vrot.slane %v3825_v56, 2 }
 0x146   :  { %v419_v3 = vrot.slane %v3834_v61, 6  ;;  %v3845_v4 = vmul.f32 %v3822_v55, %v375_v63  ;;  %695 = vmatprep.mubr.bf16.mxu1 %v3841_v1  ;;  %v427_v26 = vsel %vm423_vm1, %v416_v17, %v418_v11  ;;  %v3899_v49 = vpack.c.bf16 %v3834_v61, %v3834_v61  ;;  %v3406_v63 = vld [vmem:[#allocation5 + $0x1e8] sm:$0xff]  }
 0x147   :  { %696 = vmatmul.mubr.bf16.gmra.mxu1 %v3849_v5  ;;  %v437_v41 = vpack.c.bf16 %v427_v26, %v429_v38  ;;  %v3913_v2 = vsel %vm510_vm3, %v502_v45, %v504_v36  ;;  %v3408_v17 = vld [vmem:[#allocation5 + $0x1a8] sm:$0xff]   ;;  %v508_v38 = vrot.slane %v3834_v61, 2 }
 0x148   :  { %v3858_v12 = vpack.c.bf16 %v3845_v4, %v3845_v4  ;;  %v420_v15 = vrot.slane %v3845_v4, 6  ;;  %v432_v16 = vsel %vm423_vm1, %v419_v3, %v411_v7  ;;  %v449_v21 = vrot.slane %v3845_v4, 7  ;;  %2915 = vmatpush3.bf16.msra.mxu1 %v3393_v10 }
 0x149   :  { %2916 = vmatprep.subr.bf16.mxu1 %v3395_v13  ;;  %v434_v31 = vpack.c.bf16 %v430_v24, %v432_v16  ;;  %v428_v7 = vsel %vm423_vm1, %v413_v9, %v415_v44  ;;  %v501_v10 = vrot.slane %v3805_v37, 2  ;;  %v3405_v13 = vld [vmem:[#allocation5 + $0x90] sm:$0xff]   ;;  %v3407_v16 = vld [vmem:[#allocation5 + $0xc8] sm:$0xff]  }
 0x14a   :  { %v433_v20 = vsel %vm423_vm1, %v420_v15, %v412_v14  ;;  %703 = vmatprep.mubr.bf16.mxu1 %v3858_v12  ;;  %v460_v43 = vsel %vm450_vm2, %v449_v21, %v441_v32  ;;  %v425_v0 = vsel %vm423_vm1, %v418_v11, %v420_v15  ;;  %v436_v14 = vpack.c.bf16 %v426_v53, %v428_v7 }
 0x14b   :  { %v435_v23 = vpack.c.bf16 %v431_v19, %v433_v20  ;;  %v3907_v59 = vpack.c.bf16 %v458_v47, %v460_v43  ;;  %v3923_v11 = vsel %vm510_vm3, %v503_v54, %v505_v58  ;;  %v507_v15 = vrot.slane %v3828_v57, 2 }
 0x14c   :  { %2917 = vmatpush3.bf16.msra.mxu1 %v3397_v22  ;;  %v439_v19 = vpack.c.bf16 %v425_v0, %v425_v0  ;;  %v3928_v9 = vsel %vm510_vm3, %v501_v10, %v503_v54  ;;  %v3932_v20 = vsel %vm510_vm3, %v500_v6, %v502_v45  ;;  %v509_v22 = vrot.slane %v3845_v4, 2  ;;  %v3411_v45 = vld [vmem:[#allocation5 + $0xc0] sm:$0xff]  }
 0x14d   :  { %1056 = vmatprep.mubr.bf16.mxu0 %v435_v23  ;;  %2918 = vmatprep.subr.bf16.mxu1 %v3399_v28  ;;  %v3410_v23 = vld [vmem:[#allocation5 + $0x1e0] sm:$0xff]   ;;  %v522_v24 = vpack.c.bf16 %v3923_v11, %v3928_v9  ;;  %v3941_v26 = vsel %vm510_vm3, %v505_v58, %v507_v15  ;;  %v506_v28 = vrot.slane %v3837_v62, 2  ;;  %v476_v47 = vrot.slane %v3802_v34, 1  ;;  %v3423_v34 = vld [vmem:[#allocation5 + $0x168] sm:$0xff]   ;;  %v3478_v11 = vld [vmem:[#allocation8 + $0xd8] sm:$0xff]  }
 0x14e   :  { %1057 = vmatmul.mubr.bf16.vlgmr.msra.gmra.mxu0 %v434_v31  ;;  %v478_v31 = vrot.slane %v3825_v56, 1  ;;  %v3947_v32 = vsel %vm510_vm3, %v507_v15, %v509_v22  ;;  %v448_v53 = vrot.slane %v3834_v61, 7  ;;  %v424_v54 = vsel %vm423_vm1, %v417_v35, %v419_v3  ;;  %v3415_v35 = vld [vmem:[#allocation5 + $0x178] sm:$0xff]   ;;  %v3477_v9 = vld [vmem:[#allocation5 + $0x200] sm:$0xff]  }
 0x14f   :  { %3013 = vmatpush3.bf16.msra.mxu0 %v3400_v25  ;;  %1064 = vmatprep.mubr.bf16.mxu0 %v437_v41  ;;  %v521_v25 = vpack.c.bf16 %v3913_v2, %v3932_v20  ;;  %v3409_v41 = vld [vmem:[#allocation5 + $0x88] sm:$0xff]   ;;  %v524_v43 = vpack.c.bf16 %v3947_v32, %v3941_v26  ;;  %v3958_v44 = vsel %vm510_vm3, %v504_v36, %v506_v28  ;;  %v3414_v36 = vld [vmem:[#allocation5 + $0x1d8] sm:$0xff]   ;;  %v474_v0 = vrot.slane %v3805_v37, 1  ;;  %v3443_v37 = vld [vmem:[#allocation5 + $0x140] sm:$0xff]  }
 0x150   :  { %3014 = vmatprep.subr.bf16.mxu0 %v3402_v40  ;;  %704 = vmatmul.mubr.bf16.gmra.mxu1 %v3899_v49  ;;  %v3952_v40 = vsel %vm510_vm3, %v509_v22, %v501_v10  ;;  %v440_v7 = vrot.slane %v3808_v39, 7  ;;  %v442_v10 = vrot.slane %v3799_v33, 7  ;;  %v438_v3 = vpack.c.bf16 %v424_v54, %v424_v54  ;;  %v3418_v22 = vld [vmem:[#allocation5 + $0x1d0] sm:$0xff]   ;;  %v3422_v54 = vld [vmem:[#allocation5 + $0x1c8] sm:$0xff]   ;;  %v3486_v2 = vld [vmem:[#allocation8 + $0x178] sm:$0xff]  }
 0x151   :  { %2919 = vmatpush3.bf16.msra.mxu1 %v3401_v46  ;;  %904 = vmatprep.mubr.bf16.mxu1 %v3907_v59  ;;  %v3412_v46 = vld [vmem:[#allocation5 + $0x1a0] sm:$0xff]   ;;  %v445_v15 = vrot.slane %v3825_v56, 7  ;;  %v3435_v56 = vld [vmem:[#allocation5 + $0x150] sm:$0xff]   ;;  %v3487_v20 = vld [vmem:[#allocation8 + $0x138] sm:$0xff]  }
 0x152   :  { %2920 = vmatprep.subr.bf16.mxu1 %v3403_v50  ;;  %v3963_v50 = vsel %vm510_vm3, %v506_v28, %v508_v38  ;;  %v457_v28 = vsel %vm450_vm2, %v440_v7, %v442_v10  ;;  %v3489_v32 = vld [vmem:[#allocation8 + $0x130] sm:$0xff]  }
 0x153   :  { %3015 = vmatpush3.bf16.msra.mxu0 %v3404_v52  ;;  %v3967_v52 = vsel %vm510_vm3, %v508_v38, %v500_v6  ;;  %v523_v58 = vpack.c.bf16 %v3963_v50, %v3958_v44  ;;  %v489_v6 = vsel %vm483_vm4, %v476_v47, %v478_v31  ;;  %v3417_v38 = vld [vmem:[#allocation5 + $0x138] sm:$0xff]   ;;  %v3492_v44 = vld [vmem:[#allocation8 + $0x160] sm:$0xff]  }
 0x154   :  { %3016 = vmatprep.subr.bf16.mxu0 %v3406_v63  ;;  %v447_v63 = vrot.slane %v3828_v57, 7  ;;  %v525_v26 = vpack.c.bf16 %v3967_v52, %v3967_v52  ;;  %v3494_v50 = vld [vmem:[#allocation8 + $0x158] sm:$0xff]  }
 0x155   :  { %2921 = vmatpush3.bf16.msra.mxu1 %v3405_v13  ;;  %v3413_v13 = vld [vmem:[#allocation5 + $0x80] sm:$0xff]   ;;  %v3495_v52 = vld [vmem:[#allocation8 + $0x118] sm:$0xff]  }
 0x156   :  { %1065 = vmatmul.mubr.bf16.gmra.mxu0 %v436_v14  ;;  %2922 = vmatprep.subr.bf16.mxu1 %v3407_v16  ;;  %v3416_v14 = vld [vmem:[#allocation5 + $0x198] sm:$0xff]   ;;  %v491_v16 = vsel %vm483_vm4, %v474_v0, %v476_v47  ;;  %v3420_v47 = vld [vmem:[#allocation5 + $0x190] sm:$0xff]  }
 0x157   :  { %1072 = vmatprep.mubr.bf16.mxu0 %v439_v19  ;;  %3017 = vmatpush3.bf16.msra.mxu0 %v3408_v17  ;;  %v459_v17 = vsel %vm450_vm2, %v448_v53, %v440_v7  ;;  %v3996_v19 = vpack.c.bf16 %v489_v6, %v491_v16  ;;  %v446_v6 = vrot.slane %v3837_v62, 7  ;;  %v3421_v7 = vld [vmem:[#allocation5 + $0x130] sm:$0xff]  }
 0x158   :  { %3018 = vmatprep.subr.bf16.mxu0 %v3410_v23  ;;  %v454_v23 = vsel %vm450_vm2, %v445_v15, %v447_v63 }
 0x159   :  { %2923 = vmatpush3.bf16.msra.mxu1 %v3409_v41  ;;  %v4003_v41 = vpack.c.bf16 %v457_v28, %v459_v17  ;;  %v3425_v17 = vld [vmem:[#allocation5 + $0x128] sm:$0xff]  }
 0x15a   :  { %2924 = vmatprep.subr.bf16.mxu1 %v3411_v45  ;;  %v456_v45 = vsel %vm450_vm2, %v443_v27, %v445_v15  ;;  %v3424_v27 = vld [vmem:[#allocation5 + $0x188] sm:$0xff]   ;;  %v452_v15 = vsel %vm450_vm2, %v447_v63, %v449_v21  ;;  %v480_v21 = vrot.slane %v3828_v57, 1  ;;  %v473_v63 = vrot.slane %v3808_v39, 1  ;;  %v3431_v57 = vld [vmem:[#allocation5 + $0x158] sm:$0xff]  }
 0x15b   :  { %3019 = vmatpush3.bf16.msra.mxu0 %v3412_v46  ;;  %v3419_v46 = vld [vmem:[#allocation5 + $0x170] sm:$0xff]   ;;  %v451_v39 = vsel %vm450_vm2, %v446_v6, %v448_v53  ;;  %v3438_v53 = vld [vmem:[#allocation8 + $0x68] sm:$0xff]  }
 0x15c   :  { %3020 = vmatprep.subr.bf16.mxu0 %v3414_v36  ;;  %v4009_v36 = vpack.c.bf16 %v454_v23, %v456_v45  ;;  %v475_v23 = vrot.slane %v3799_v33, 1  ;;  %v4028_v45 = vpack.c.bf16 %v452_v15, %v452_v15  ;;  %v3429_v33 = vld [vmem:[#allocation5 + $0x120] sm:$0xff]   ;;  %v3433_v15 = vld [vmem:[#allocation5 + $0x118] sm:$0xff]  }
 0x15d   :  { %2925 = vmatpush3.bf16.msra.mxu1 %v3413_v13  ;;  %v444_v13 = vrot.slane %v3831_v60, 7 }
 0x15e   :  { %1073 = vmatmul.mubr.bf16.gmra.mxu0 %v438_v3  ;;  %2978 = vmatprep.subr.bf16.mxu1 %v3415_v35  ;;  %v3426_v35 = vld [vmem:[#allocation5 + $0x1c0] sm:$0xff]  }
 0x15f   :  { %1431 = vmatprep.mubr.bf16.mxu0 %v3996_v19  ;;  %3021 = vmatpush3.bf16.msra.mxu0 %v3416_v14  ;;  %v453_v3 = vsel %vm450_vm2, %v444_v13, %v446_v6  ;;  %v477_v14 = vrot.slane %v3831_v60, 1  ;;  %v455_v16 = vsel %vm450_vm2, %v442_v10, %v444_v13  ;;  %v3428_v60 = vld [vmem:[#allocation5 + $0x180] sm:$0xff]   ;;  %v3432_v13 = vld [vmem:[#allocation8 + $0x38] sm:$0xff]   ;;  %v3437_v6 = vld [vmem:[#allocation5 + $0x110] sm:$0xff]  }
 0x160   :  { %3022 = vmatprep.subr.bf16.mxu0 %v3418_v22  ;;  %905 = vmatmul.mubr.bf16.vlgmr.msra.gmra.mxu1 %v4003_v41  ;;  %v482_v22 = vrot.slane %v3845_v4, 1  ;;  %v4026_v28 = vpack.c.bf16 %v453_v3, %v455_v16  ;;  %v479_v3 = vrot.slane %v3837_v62, 1  ;;  %v4055_v16 = vpack.c.bf16 %v451_v39, %v451_v39  ;;  %v3450_v39 = vld [vmem:[#allocation8 + $0x50] sm:$0xff]  }
 0x161   :  { %912 = vmatprep.mubr.bf16.mxu1 %v4009_v36  ;;  %2979 = vmatpush3.bf16.msra.mxu1 %v3417_v38  ;;  %v3427_v38 = vld [vmem:[#allocation5 + $0x160] sm:$0xff]   ;;  %v488_v4 = vsel %vm483_vm4, %v475_v23, %v477_v14 }
 0x162   :  { %2980 = vmatprep.subr.bf16.mxu1 %v3419_v46  ;;  %v3430_v46 = vld [vmem:[#allocation8 + $0x78] sm:$0xff]   ;;  %v485_v10 = vsel %vm483_vm4, %v480_v21, %v482_v22 }
 0x163   :  { %3023 = vmatpush3.bf16.msra.mxu0 %v3420_v47  ;;  %v490_v47 = vsel %vm483_vm4, %v473_v63, %v475_v23  ;;  %v3439_v23 = vld [vmem:[#allocation5 + $0x148] sm:$0xff]  }
 0x164   :  { %3024 = vmatprep.subr.bf16.mxu0 %v3422_v54  ;;  %v4040_v54 = vpack.c.bf16 %v488_v4, %v490_v47  ;;  %v3446_v4 = vld [vmem:[#allocation8 + $0x58] sm:$0xff]  }
 0x165   :  { %2981 = vmatpush3.bf16.msra.mxu1 %v3421_v7  ;;  %v487_v7 = vsel %vm483_vm4, %v478_v31, %v480_v21  ;;  %v3436_v31 = vld [vmem:[#allocation8 + $0x30] sm:$0xff]   ;;  %v3441_v21 = vld [vmem:[#allocation5 + $0x108] sm:$0xff]  }
 0x166   :  { %2982 = vmatprep.subr.bf16.mxu1 %v3423_v34  ;;  %v4050_v34 = vpack.c.bf16 %v485_v10, %v487_v7  ;;  %v3447_v10 = vld [vmem:[#allocation5 + $0x278] sm:$0xff]  }
 0x167   :  { %3025 = vmatpush3.bf16.msra.mxu0 %v3424_v27  ;;  %v3434_v27 = vld [vmem:[#allocation8 + $0x70] sm:$0xff]   ;;  %v3449_v7 = vld [vmem:[#allocation5 + $0x238] sm:$0xff]  }
 0x168   :  { %3026 = vmatprep.subr.bf16.mxu0 %v3426_v35  ;;  %913 = vmatmul.mubr.bf16.gmra.mxu1 %v4026_v28  ;;  %v481_v35 = vrot.slane %v3834_v61, 1  ;;  %v486_v61 = vsel %vm483_vm4, %v477_v14, %v479_v3  ;;  %v3442_v14 = vld [vmem:[#allocation8 + $0x60] sm:$0xff]  }
 0x169   :  { %920 = vmatprep.mubr.bf16.mxu1 %v4028_v45  ;;  %2983 = vmatpush3.bf16.msra.mxu1 %v3425_v17  ;;  %v493_v17 = vsel %vm483_vm4, %v482_v22, %v474_v0  ;;  %v3444_v0 = vld [vmem:[#allocation8 + $0x20] sm:$0xff]  }
 0x16a   :  { %2984 = vmatprep.subr.bf16.mxu1 %v3427_v38  ;;  %v484_v62 = vsel %vm483_vm4, %v479_v3, %v481_v35  ;;  %v492_v22 = vsel %vm483_vm4, %v481_v35, %v473_v63  ;;  %v3452_v63 = vld [vmem:[#allocation8 + $0x10] sm:$0xff]   ;;  %v3455_v35 = vld [vmem:[#allocation5 + $0x268] sm:$0xff]  }
 0x16b   :  { %3027 = vmatpush3.bf16.msra.mxu0 %v3428_v60  ;;  %v4068_v38 = vpack.c.bf16 %v484_v62, %v486_v61  ;;  %v3440_v60 = vld [vmem:[#allocation8 + $0x28] sm:$0xff]   ;;  %v4076_v47 = vpack.c.bf16 %v492_v22, %v492_v22  ;;  %v3453_v3 = vld [vmem:[#allocation5 + $0x230] sm:$0xff]   ;;  %v3460_v62 = vld [vmem:[#allocation8] sm:$0xff]  }
 0x16c   :  { %3080 = vmatprep.subr.bf16.mxu0 %v3430_v46  ;;  %v4070_v46 = vpack.c.bf16 %v493_v17, %v493_v17  ;;  %v3462_v61 = vld [vmem:[#allocation8 + $0xf8] sm:$0xff]   ;;  %v3471_v22 = vld [vmem:[#allocation5 + $0x248] sm:$0xff]  }
 0x16d   :  { %2985 = vmatpush3.bf16.msra.mxu1 %v3429_v33  ;;  %v3445_v33 = vld [vmem:[#allocation5 + $0x100] sm:$0xff]   ;;  %v3464_v17 = vld [vmem:[#allocation8 + $0xb8] sm:$0xff]  }
 0x16e   :  { %1432 = vmatmul.mubr.bf16.vlgmr.msra.gmra.mxu0 %v4040_v54  ;;  %2986 = vmatprep.subr.bf16.mxu1 %v3431_v57  ;;  %v3448_v57 = vld [vmem:[#allocation8 + $0x18] sm:$0xff]  }
 0x16f   :  { %1439 = vmatprep.mubr.bf16.mxu0 %v4050_v34  ;;  %3081 = vmatpush3.bf16.msra.mxu0 %v3432_v13  ;;  %v3451_v13 = vld [vmem:[#allocation5 + $0x270] sm:$0xff]  }
 0x170   :  { %921 = vmatmul.mubr.bf16.gmra.mxu1 %v4055_v16  ;;  %3082 = vmatprep.subr.bf16.mxu0 %v3434_v27  ;;  %v3454_v27 = vld [vmem:[#allocation8 + $0x48] sm:$0xff]  }
 0x171   :  { %2987 = vmatpush3.bf16.msra.mxu1 %v3433_v15  ;;  %1241 = vmatprep.mubr.bf16.mxu1 %v3812_v42  ;;  %v3456_v15 = vld [vmem:[#allocation8 + $0x8] sm:$0xff]  }
 0x172   :  { %2988 = vmatprep.subr.bf16.mxu1 %v3435_v56  ;;  %v3458_v56 = vld [vmem:[#allocation8 + $0x40] sm:$0xff]  }
 0x173   :  { %3083 = vmatpush3.bf16.msra.mxu0 %v3436_v31  ;;  %v3457_v31 = vld [vmem:[#allocation5 + $0x228] sm:$0xff]  }
 0x174   :  { %3084 = vmatprep.subr.bf16.mxu0 %v3438_v53  ;;  %v3461_v53 = vld [vmem:[#allocation5 + $0x220] sm:$0xff]  }
 0x175   :  { %2989 = vmatpush3.bf16.msra.mxu1 %v3437_v6  ;;  %v3463_v6 = vld [vmem:[#allocation5 + $0x258] sm:$0xff]  }
 0x176   :  { %1440 = vmatmul.mubr.bf16.gmra.mxu0 %v4068_v38  ;;  %2990 = vmatprep.subr.bf16.mxu1 %v3439_v23  ;;  %v3466_v23 = vld [vmem:[#allocation8 + $0xf0] sm:$0xff]  }
 0x177   :  { %1447 = vmatprep.mubr.bf16.mxu0 %v4070_v46  ;;  %3085 = vmatpush3.bf16.msra.mxu0 %v3440_v60  ;;  %v3465_v60 = vld [vmem:[#allocation5 + $0x218] sm:$0xff]  }
 0x178   :  { %3086 = vmatprep.subr.bf16.mxu0 %v3442_v14  ;;  %v3467_v14 = vld [vmem:[#allocation5 + $0x250] sm:$0xff]  }
 0x179   :  { %2991 = vmatpush3.bf16.msra.mxu1 %v3441_v21  ;;  %v3468_v21 = vld [vmem:[#allocation8 + $0xb0] sm:$0xff]  }
 0x17a   :  { %2992 = vmatprep.subr.bf16.mxu1 %v3443_v37  ;;  %v3470_v37 = vld [vmem:[#allocation8 + $0xe8] sm:$0xff]  }
 0x17b   :  { %3087 = vmatpush3.bf16.msra.mxu0 %v3444_v0  ;;  %v3469_v0 = vld [vmem:[#allocation5 + $0x210] sm:$0xff]  }
 0x17c   :  { %3088 = vmatprep.subr.bf16.mxu0 %v3446_v4  ;;  %v3474_v4 = vld [vmem:[#allocation8 + $0xe0] sm:$0xff]  }
 0x17d   :  { %2993 = vmatpush3.bf16.msra.mxu1 %v3445_v33  ;;  %v3475_v33 = vld [vmem:[#allocation5 + $0x240] sm:$0xff]  }
 0x17e   :  { %1448 = vmatmul.mubr.bf16.gmra.mxu0 %v4076_v47  ;;  %3046 = vmatprep.subr.bf16.mxu1 %v3447_v10  ;;  %v3476_v10 = vld [vmem:[#allocation8 + $0xa0] sm:$0xff]  }
 0x17f   :  { %1877 = vmatprep.mubr.bf16.mxu0 %v3907_v59  ;;  %3089 = vmatpush3.bf16.msra.mxu0 %v3448_v57  ;;  %v3459_v59 = vld [vmem:[#allocation5 + $0x260] sm:$0xff]   ;;  %v3480_v57 = vld [vmem:[#allocation8 + $0xd0] sm:$0xff]  }
 0x180   :  { %1242 = vmatmul.mubr.bf16.vlgmr.msra.gmra.mxu1 %v3816_v48  ;;  %3090 = vmatprep.subr.bf16.mxu0 %v3450_v39  ;;  %v3483_v39 = vld [vmem:[#allocation8 + $0x88] sm:$0xff]  }
 0x181   :  { %1249 = vmatprep.mubr.bf16.mxu1 %v3841_v1  ;;  %3047 = vmatpush3.bf16.msra.mxu1 %v3449_v7  ;;  %v3484_v7 = vld [vmem:[#allocation8 + $0xc0] sm:$0xff]  }
 0x182   :  { %3048 = vmatprep.subr.bf16.mxu1 %v3451_v13  ;;  %v3498_v13 = vld [vmem:[#allocation8 + $0x148] sm:$0xff]  }
 0x183   :  { %3091 = vmatpush3.bf16.msra.mxu0 %v3452_v63  ;;  %v3501_v63 = vld [vmem:[#allocation8 + $0x100] sm:$0xff]  }
 0x184   :  { %3092 = vmatprep.subr.bf16.mxu0 %v3454_v27  ;;  %v3503_v27 = vld [vmem:[#allocation7 + $0x30] sm:$0xff]  }
 0x185   :  { %3049 = vmatpush3.bf16.msra.mxu1 %v3453_v3 }
 0x186   :  { %3050 = vmatprep.subr.bf16.mxu1 %v3455_v35 }
 0x187   :  { %3093 = vmatpush3.bf16.msra.mxu0 %v3456_v15  ;;  %v3508_v15 = vld [vmem:[#allocation7 + $0x8] sm:$0xff]  }
 0x188   :  { %1250 = vmatmul.mubr.bf16.gmra.mxu1 %v3849_v5  ;;  %3094 = vmatprep.subr.bf16.mxu0 %v3458_v56 }
 0x189   :  { %1257 = vmatprep.mubr.bf16.mxu1 %v3858_v12  ;;  %3051 = vmatpush3.bf16.msra.mxu1 %v3457_v31 }
 0x18a   :  { %3052 = vmatprep.subr.bf16.mxu1 %v3459_v59 }
 0x18b   :  { %3095 = vmatpush3.bf16.msra.mxu0 %v3460_v62  ;;  %v3509_v62 = vld [vmem:[#allocation7] sm:$0xff]  }
 0x18c   :  { %3125 = vmatprep.subr.bf16.mxu0 %v3462_v61 }
 0x18d   :  { %3053 = vmatpush3.bf16.msra.mxu1 %v3461_v53 }
 0x18e   :  { %1878 = vmatmul.mubr.bf16.vlgmr.msra.gmra.mxu0 %v4003_v41  ;;  %3054 = vmatprep.subr.bf16.mxu1 %v3463_v6  ;;  %v3472_v41 = vld [vmem:[#allocation8 + $0xa8] sm:$0xff]  }
 0x18f   :  { %1885 = vmatprep.mubr.bf16.mxu0 %v4009_v36  ;;  %3126 = vmatpush3.bf16.msra.mxu0 %v3464_v17  ;;  %v3473_v36 = vld [vmem:[#allocation5 + $0x208] sm:$0xff]  }
 0x190   :  { %1258 = vmatmul.mubr.bf16.gmra.mxu1 %v3899_v49  ;;  %3127 = vmatprep.subr.bf16.mxu0 %v3466_v23 }
 0x191   :  { %3055 = vmatpush3.bf16.msra.mxu1 %v3465_v60  ;;  %1621 = vmatprep.mubr.bf16.mxu1 %v522_v24  ;;  %v3479_v24 = vld [vmem:[#allocation8 + $0x98] sm:$0xff]  }
 0x192   :  { %3056 = vmatprep.subr.bf16.mxu1 %v3467_v14 }
 0x193   :  { %3128 = vmatpush3.bf16.msra.mxu0 %v3468_v21 }
 0x194   :  { %3129 = vmatprep.subr.bf16.mxu0 %v3470_v37 }
 0x195   :  { %3057 = vmatpush3.bf16.msra.mxu1 %v3469_v0 }
 0x196   :  { %1886 = vmatmul.mubr.bf16.gmra.mxu0 %v4026_v28  ;;  %3058 = vmatprep.subr.bf16.mxu1 %v3471_v22  ;;  %v3481_v28 = vld [vmem:[#allocation8 + $0x90] sm:$0xff]  }
 0x197   :  { %1893 = vmatprep.mubr.bf16.mxu0 %v4028_v45  ;;  %3130 = vmatpush3.bf16.msra.mxu0 %v3472_v41  ;;  %v3482_v45 = vld [vmem:[#allocation8 + $0xc8] sm:$0xff]  }
 0x198   :  { %3131 = vmatprep.subr.bf16.mxu0 %v3474_v4 }
 0x199   :  { %3059 = vmatpush3.bf16.msra.mxu1 %v3473_v36 }
 0x19a   :  { %3060 = vmatprep.subr.bf16.mxu1 %v3475_v33 }
 0x19b   :  { %3132 = vmatpush3.bf16.msra.mxu0 %v3476_v10 }
 0x19c   :  { %3133 = vmatprep.subr.bf16.mxu0 %v3478_v11 }
 0x19d   :  { %3061 = vmatpush3.bf16.msra.mxu1 %v3477_v9 }
 0x19e   :  { %1894 = vmatmul.mubr.bf16.gmra.mxu0 %v4055_v16  ;;  %v526_v16 = vpack.c.bf16 %v3952_v40, %v3952_v40  ;;  %v3490_v40 = vld [vmem:[#allocation8 + $0x168] sm:$0xff]  }
 0x19f   :  { %3134 = vmatpush3.bf16.msra.mxu0 %v3479_v24  ;;  %2183 = vmatprep.mubr.bf16.mxu0 %v3812_v42  ;;  %v3485_v42 = vld [vmem:[#allocation8 + $0x80] sm:$0xff]  }
 0x1a0   :  { %1622 = vmatmul.mubr.bf16.vlgmr.msra.gmra.mxu1 %v521_v25  ;;  %3135 = vmatprep.subr.bf16.mxu0 %v3480_v57  ;;  %v3488_v25 = vld [vmem:[#allocation8 + $0x170] sm:$0xff]  }
 0x1a1   :  { %1629 = vmatprep.mubr.bf16.mxu1 %v524_v43  ;;  %v3491_v43 = vld [vmem:[#allocation8 + $0x128] sm:$0xff]  }
 0x1a3   :  { %3136 = vmatpush3.bf16.msra.mxu0 %v3481_v28 }
 0x1a4   :  { %3137 = vmatprep.subr.bf16.mxu0 %v3482_v45 }
 0x1a7   :  { %3138 = vmatpush3.bf16.msra.mxu0 %v3483_v39 }
 0x1a8   :  { %1630 = vmatmul.mubr.bf16.gmra.mxu1 %v523_v58  ;;  %3139 = vmatprep.subr.bf16.mxu0 %v3484_v7  ;;  %v3497_v58 = vld [vmem:[#allocation8 + $0x110] sm:$0xff]  }
 0x1a9   :  { %1637 = vmatprep.mubr.bf16.mxu1 %v526_v16 }
 0x1ab   :  { %3140 = vmatpush3.bf16.msra.mxu0 %v3485_v42 }
 0x1ac   :  { %3170 = vmatprep.subr.bf16.mxu0 %v3486_v2 }
 0x1ae   :  { %2184 = vmatmul.mubr.bf16.vlgmr.msra.gmra.mxu0 %v3816_v48  ;;  %v3493_v48 = vld [vmem:[#allocation8 + $0x120] sm:$0xff]  }
 0x1af   :  { %2191 = vmatprep.mubr.bf16.mxu0 %v3841_v1  ;;  %3171 = vmatpush3.bf16.msra.mxu0 %v3487_v20  ;;  %v3496_v1 = vld [vmem:[#allocation8 + $0x150] sm:$0xff]  }
 0x1b0   :  { %1638 = vmatmul.mubr.bf16.gmra.mxu1 %v525_v26  ;;  %3172 = vmatprep.subr.bf16.mxu0 %v3488_v25 }
 0x1b3   :  { %3173 = vmatpush3.bf16.msra.mxu0 %v3489_v32 }
 0x1b4   :  { %3174 = vmatprep.subr.bf16.mxu0 %v3490_v40 }
 0x1b6   :  { %2192 = vmatmul.mubr.bf16.gmra.mxu0 %v3849_v5  ;;  %v3499_v5 = vld [vmem:[#allocation8 + $0x108] sm:$0xff]  }
 0x1b7   :  { %2199 = vmatprep.mubr.bf16.mxu0 %v3858_v12  ;;  %3175 = vmatpush3.bf16.msra.mxu0 %v3491_v43  ;;  %v3500_v12 = vld [vmem:[#allocation8 + $0x140] sm:$0xff]  }
 0x1b8   :  { %3176 = vmatprep.subr.bf16.mxu0 %v3492_v44 }
 0x1bb   :  { %3177 = vmatpush3.bf16.msra.mxu0 %v3493_v48 }
 0x1bc   :  { %3178 = vmatprep.subr.bf16.mxu0 %v3494_v50 }
 0x1be   :  { %2200 = vmatmul.mubr.bf16.gmra.mxu0 %v3899_v49  ;;  %v3664_v49 = vmov 0.0  }
 0x1bf   :  { %3179 = vmatpush3.bf16.msra.mxu0 %v3495_v52  ;;  %2494 = vmatprep.mubr.bf16.mxu0 %v3996_v19  ;;  %v3502_v19 = vld [vmem:[#allocation7 + $0x38] sm:$0xff]  }
 0x1c0   :  { %3180 = vmatprep.subr.bf16.mxu0 %v3496_v1  ;;  %3215 = vmatprep.subr.bf16.mxu1 %v3664_v49 }
 0x1c1   :  { %3216 = vmatpush3.bf16.msra.mxu1 %v3502_v19  ;;  %3231 = vmatprep.mubr.msk.bf16.mxu1 %vm3665_vm5, %v3664_v49 }
 0x1c2   :  { %3217 = vmatprep.subr.bf16.mxu1 %v3664_v49 }
 0x1c3   :  { %3181 = vmatpush3.bf16.msra.mxu0 %v3497_v58 }
 0x1c4   :  { %3182 = vmatprep.subr.bf16.mxu0 %v3498_v13 }
 0x1c5   :  { %3218 = vmatpush3.bf16.msra.mxu1 %v3503_v27 }
 0x1c6   :  { %3219 = vmatprep.subr.bf16.mxu1 %v3664_v49 }
 0x1c7   :  { %3183 = vmatpush3.bf16.msra.mxu0 %v3499_v5 }
 0x1c8   :  { %3184 = vmatprep.subr.bf16.mxu0 %v3500_v12 }
 0x1cb   :  { %3185 = vmatpush3.bf16.msra.mxu0 %v3501_v63 }
 0x1ce   :  { %2495 = vmatmul.mubr.bf16.vlgmr.msra.gmra.mxu0 %v4040_v54  ;;  %v3504_v54 = vld [vmem:[#allocation7 + $0x28] sm:$0xff]  }
 0x1cf   :  { %2502 = vmatprep.mubr.bf16.mxu0 %v4050_v34  ;;  %3220 = vmatpush3.bf16.msra.mxu1 %v3504_v54  ;;  %v3505_v34 = vld [vmem:[#allocation7 + $0x20] sm:$0xff]  }
 0x1d0   :  { %3221 = vmatprep.subr.bf16.mxu1 %v3664_v49 }
 0x1d3   :  { %3222 = vmatpush3.bf16.msra.mxu1 %v3505_v34 }
 0x1d4   :  { %3223 = vmatprep.subr.bf16.mxu1 %v3664_v49 }
 0x1d6   :  { %2503 = vmatmul.mubr.bf16.gmra.mxu0 %v4068_v38  ;;  %v3506_v38 = vld [vmem:[#allocation7 + $0x18] sm:$0xff]  }
 0x1d7   :  { %2510 = vmatprep.mubr.bf16.mxu0 %v4070_v46  ;;  %3224 = vmatpush3.bf16.msra.mxu1 %v3506_v38  ;;  %v3507_v46 = vld [vmem:[#allocation7 + $0x10] sm:$0xff]  }
 0x1d8   :  { %3225 = vmatprep.subr.bf16.mxu1 %v3664_v49 }
 0x1db   :  { %3226 = vmatpush3.bf16.msra.mxu1 %v3507_v46 }
 0x1dc   :  { %3227 = vmatprep.subr.bf16.mxu1 %v3664_v49 }
 0x1de   :  { %2511 = vmatmul.mubr.bf16.gmra.mxu0 %v4076_v47 }
 0x1df   :  { %3228 = vmatpush3.bf16.msra.mxu1 %v3508_v15 }
 0x1e0   :  { %3229 = vmatprep.subr.bf16.mxu1 %v3664_v49 }
 0x1e3   :  { %3230 = vmatpush3.bf16.msra.mxu1 %v3509_v62 }
 0x1e4   :  { %3243 = vmatprep.subr.bf16.mxu1 %v3664_v49 }
 0x1ff   :  { %v2892_v47 = vpop.f32.mrf.mxu1 }
 0x201   :  { %v2893_v3 = vpop.f32.mrf.mxu1 }
 0x202   :  { %v4126_v35 = vadd.f32 %v2893_v3, %v2892_v47 }
 0x203   :  { %v2895_v56 = vpop.f32.mrf.mxu1 }
 0x205   :  { %v2896_v31 = vpop.f32.mrf.mxu1 }
 0x206   :  { %v4129_v59 = vadd.f32 %v2896_v31, %v2895_v56 }
 0x207   :  { %v2898_v61 = vpop.f32.mrf.mxu1 }
 0x209   :  { %v2899_v53 = vpop.f32.mrf.mxu1 }
 0x20a   :  { %v4132_v6 = vadd.f32 %v2899_v53, %v2898_v61 }
 0x20b   :  { %v2901_v17 = vpop.f32.mrf.mxu1 }
 0x20d   :  { %v2902_v60 = vpop.f32.mrf.mxu1 }
 0x20e   :  { %v2960_v23 = vpop.f32.mrf.mxu0  ;;  %v4135_v21 = vadd.f32 %v2902_v60, %v2901_v17 }
 0x210   :  { %v2961_v14 = vpop.f32.mrf.mxu0  ;;  %v2904_v0 = vpop.f32.mrf.mxu1 }
 0x211   :  { %v2962_v37 = vadd.f32 %v2961_v14, %v2960_v23 }
 0x212   :  { %v2963_v22 = vpop.f32.mrf.mxu0  ;;  %v2905_v41 = vpop.f32.mrf.mxu1 }
 0x213   :  { %v4137_v36 = vadd.f32 %v2905_v41, %v2904_v0 }
 0x214   :  { %v2964_v4 = vpop.f32.mrf.mxu0  ;;  %v2907_v10 = vpop.f32.mrf.mxu1 }
 0x215   :  { %v2965_v33 = vadd.f32 %v2964_v4, %v2963_v22 }
 0x216   :  { %v2966_v11 = vpop.f32.mrf.mxu0  ;;  %v2908_v9 = vpop.f32.mrf.mxu1 }
 0x218   :  { %v2967_v24 = vpop.f32.mrf.mxu0 }
 0x219   :  { %v2968_v57 = vadd.f32 %v2967_v24, %v2966_v11 }
 0x21a   :  { %v2969_v28 = vpop.f32.mrf.mxu0 }
 0x21c   :  { %v2970_v45 = vpop.f32.mrf.mxu0 }
 0x21d   :  { %v2971_v39 = vadd.f32 %v2970_v45, %v2969_v28 }
 0x21e   :  { %v2972_v7 = vpop.f32.mrf.mxu0 }
 0x220   :  { %v2973_v16 = vpop.f32.mrf.mxu0  ;;  %v2926_v2 = vpop.f32.mrf.mxu1 }
 0x221   :  { %v4139_v42 = vadd.f32 %v2973_v16, %v2972_v7 }
 0x222   :  { %v2975_v20 = vpop.f32.mrf.mxu0  ;;  %v2927_v25 = vpop.f32.mrf.mxu1 }
 0x223   :  { %v2928_v32 = vadd.f32 %v2927_v25, %v2926_v2 }
 0x224   :  { %v2976_v26 = vpop.f32.mrf.mxu0  ;;  %v2929_v40 = vpop.f32.mrf.mxu1 }
 0x225   :  { %v1059_v43 = vadd.f32 %v2962_v37, %v2928_v32 }
 0x226   :  { %v2930_v44 = vpop.f32.mrf.mxu1 }
 0x227   :  { %v2931_v48 = vadd.f32 %v2930_v44, %v2929_v40 }
 0x228   :  { %v2932_v50 = vpop.f32.mrf.mxu1 }
 0x229   :  { %v4141_v52 = vadd.f32 %v2965_v33, %v2931_v48 }
 0x22a   :  { %v2933_v1 = vpop.f32.mrf.mxu1 }
 0x22b   :  { %v2934_v58 = vadd.f32 %v2933_v1, %v2932_v50 }
 0x22c   :  { %v2935_v13 = vpop.f32.mrf.mxu1 }
 0x22d   :  { %v1067_v5 = vadd.f32 %v2968_v57, %v2934_v58 }
 0x22e   :  { %v3028_v12 = vpop.f32.mrf.mxu0  ;;  %v2936_v63 = vpop.f32.mrf.mxu1 }
 0x22f   :  { %v2937_v19 = vadd.f32 %v2936_v63, %v2935_v13 }
 0x230   :  { %v3029_v27 = vpop.f32.mrf.mxu0  ;;  %v4143_v54 = vpop.f32.mrf.mxu1 }
 0x231   :  { %v3030_v34 = vadd.f32 %v3029_v27, %v3028_v12  ;;  %v4145_v38 = vadd.f32 %v2971_v39, %v2937_v19 }
 0x232   :  { %v3031_v46 = vpop.f32.mrf.mxu0  ;;  %v2939_v47 = vpop.f32.mrf.mxu1 }
 0x234   :  { %v3032_v3 = vpop.f32.mrf.mxu0  ;;  %v2941_v15 = vpop.f32.mrf.mxu1 }
 0x236   :  { %v3034_v56 = vpop.f32.mrf.mxu0  ;;  %v2942_v31 = vpop.f32.mrf.mxu1 }
 0x238   :  { %v3035_v62 = vpop.f32.mrf.mxu0 }
 0x239   :  { %v3036_v61 = vadd.f32 %v3035_v62, %v3034_v56 }
 0x23a   :  { %v4147_v53 = vpop.f32.mrf.mxu0 }
 0x23c   :  { %v4149_v17 = vpop.f32.mrf.mxu0 }
 0x23e   :  { %v4151_v23 = vpop.f32.mrf.mxu0 }
 0x240   :  { %v4153_v60 = vpop.f32.mrf.mxu0  ;;  %v2994_v14 = vpop.f32.mrf.mxu1 }
 0x242   :  { %v3043_v37 = vpop.f32.mrf.mxu0  ;;  %v2995_v0 = vpop.f32.mrf.mxu1 }
 0x243   :  { %v2996_v22 = vadd.f32 %v2995_v0, %v2994_v14  ;;  %v2802_v14 = vld [vmem:[%s4340_s5] ss:$0 sm:$0xff] }
 0x244   :  { %v3044_v41 = vpop.f32.mrf.mxu0  ;;  %v2997_v4 = vpop.f32.mrf.mxu1 }
 0x245   :  { %v1265_v33 = vadd.f32 %v2996_v22, %v1059_v43  ;;  %v3033_v22 = vadd.f32 %v3032_v3, %v3031_v46 }
 0x246   :  { %v2998_v10 = vpop.f32.mrf.mxu1 }
 0x247   :  { %v1455_v11 = vadd.f32 %v3030_v34, %v1265_v33  ;;  %v2999_v19 = vadd.f32 %v2998_v10, %v2997_v4 }
 0x248   :  { %v3000_v9 = vpop.f32.mrf.mxu1 }
 0x249   :  { %v1266_v62 = vadd.f32 %v2999_v19, %v4141_v52 }
 0x24a   :  { %v3001_v24 = vpop.f32.mrf.mxu1 }
 0x24b   :  { %v3002_v57 = vadd.f32 %v3001_v24, %v3000_v9  ;;  %v1456_v4 = vadd.f32 %v3033_v22, %v1266_v62  ;;  %v2940_v24 = vadd.f32 %v2939_v47, %v4143_v54  ;;  %v3039_v54 = vadd.f32 %v4149_v17, %v4147_v53 }
 0x24c   :  { %v3003_v28 = vpop.f32.mrf.mxu1 }
 0x24d   :  { %v1267_v45 = vadd.f32 %v3002_v57, %v1067_v5 }
 0x24e   :  { %v3004_v39 = vpop.f32.mrf.mxu1  ;;  %v3096_v7 = vpop.f32.mrf.mxu0 }
 0x24f   :  { %v1457_v16 = vadd.f32 %v3036_v61, %v1267_v45  ;;  %v3005_v57 = vadd.f32 %v3004_v39, %v3003_v28 }
 0x250   :  { %v3006_v2 = vpop.f32.mrf.mxu1  ;;  %v3097_v20 = vpop.f32.mrf.mxu0 }
 0x251   :  { %v4155_v25 = vadd.f32 %v3097_v20, %v3096_v7 }
 0x252   :  { %v3007_v26 = vpop.f32.mrf.mxu1  ;;  %v3099_v32 = vpop.f32.mrf.mxu0 }
 0x253   :  { %v3008_v52 = vadd.f32 %v3007_v26, %v3006_v2 }
 0x254   :  { %v3009_v40 = vpop.f32.mrf.mxu1  ;;  %v3100_v44 = vpop.f32.mrf.mxu0 }
 0x255   :  { %v4157_v48 = vadd.f32 %v3100_v44, %v3099_v32 }
 0x256   :  { %v3010_v43 = vpop.f32.mrf.mxu1  ;;  %v3102_v50 = vpop.f32.mrf.mxu0 }
 0x257   :  { %v1075_v43 = vadd.f32 %v4139_v42, %v2940_v24  ;;  %v3042_v42 = vadd.f32 %v4153_v60, %v4151_v23 }
 0x258   :  { %v3103_v1 = vpop.f32.mrf.mxu0 }
 0x259   :  { %v4159_v58 = vadd.f32 %v3103_v1, %v3102_v50  ;;  %v1268_v50 = vadd.f32 %v3005_v57, %v4145_v38  ;;  %v1269_v47 = vadd.f32 %v3008_v52, %v1075_v43 }
 0x25a   :  { %v3105_v13 = vpop.f32.mrf.mxu0 }
 0x25c   :  { %v3106_v5 = vpop.f32.mrf.mxu0 }
 0x25d   :  { %v4161_v12 = vadd.f32 %v3106_v5, %v3105_v13  ;;  %v1458_v5 = vadd.f32 %v3039_v54, %v1268_v50 }
 0x25e   :  { %v3108_v63 = vpop.f32.mrf.mxu0 }
 0x260   :  { %v3062_v27 = vpop.f32.mrf.mxu1  ;;  %v3109_v34 = vpop.f32.mrf.mxu0 }
 0x261   :  { %v4163_v15 = vadd.f32 %v3109_v34, %v3108_v63 }
 0x262   :  { %v3063_v56 = vpop.f32.mrf.mxu1  ;;  %v3111_v31 = vpop.f32.mrf.mxu0 }
 0x263   :  { %v3064_v61 = vadd.f32 %v3063_v56, %v3062_v27  ;;  %v1459_v56 = vadd.f32 %v3042_v42, %v1269_v47 }
 0x264   :  { %v3065_v37 = vpop.f32.mrf.mxu1  ;;  %v3112_v0 = vpop.f32.mrf.mxu0 }
 0x265   :  { %v1645_v41 = vadd.f32 %v3064_v61, %v1455_v11 }
 0x266   :  { %v3066_v33 = vpop.f32.mrf.mxu1 }
 0x267   :  { %v1657_v9 = vadd.f32 %v2802_v14, %v1645_v41  ;;  %v3067_v10 = vadd.f32 %v3066_v33, %v3065_v37 }
 0x268   :  { %v3068_v45 = vpop.f32.mrf.mxu1 }
 0x269   :  { %v1662_v7 = vmax.f32 %v1657_v9, 0.0  ;;  %v1646_v20 = vadd.f32 %v3067_v10, %v1456_v4 }
 0x26a   :  { %v3069_v32 = vpop.f32.mrf.mxu1 }
 0x26b   :  { %v1658_v40 = vadd.f32 %v2802_v14, %v1646_v20  ;;  %v3070_v44 = vadd.f32 %v3069_v32, %v3068_v45  ;;  %v4173_v46 = vmul.f32 %v1662_v7, %v3792_v18 }
 0x26c   :  { %v3071_v3 = vpop.f32.mrf.mxu1 }
 0x26d   :  { %v1663_v11 = vmax.f32 %v1658_v40, 0.0  ;;  %v1647_v1 = vadd.f32 %v3070_v44, %v1457_v16  ;;  %v1672_v18 = vrot.slane %v4173_v46, 7  ;;  %v1688_v38 = vrot.slane %v4173_v46, 1 }
 0x26e   :  { %v3072_v28 = vpop.f32.mrf.mxu1  ;;  %v3141_v39 = vpop.f32.mrf.mxu0 }
 0x26f   :  { %v4178_v2 = vmul.f32 %v1663_v11, %v3796_v30  ;;  %v1659_v26 = vadd.f32 %v2802_v14, %v1647_v1  ;;  %v3073_v13 = vadd.f32 %v3072_v28, %v3071_v3 }
 0x270   :  { %v3074_v16 = vpop.f32.mrf.mxu1  ;;  %v3142_v63 = vpop.f32.mrf.mxu0 }
 0x271   :  { %v1673_v53 = vrot.slane %v4178_v2, 7  ;;  %v1685_v17 = vpack.c.bf16 %v4178_v2, %v4173_v46  ;;  %v1689_v30 = vrot.slane %v4178_v2, 1  ;;  %v1664_v19 = vmax.f32 %v1659_v26, 0.0  ;;  %v3521_v46 = vld [vmem:[#allocation7 + $0xa0] sm:$0xff]   ;;  %v3522_v2 = vld [vmem:[#allocation7 + $0x98] sm:$0xff]  }
 0x272   :  { %v1648_v27 = vadd.f32 %v3073_v13, %v1458_v5  ;;  %v4188_v34 = vadd.f32 %v3142_v63, %v3141_v39  ;;  %v3075_v23 = vpop.f32.mrf.mxu1  ;;  %v3144_v60 = vpop.f32.mrf.mxu0  ;;  %v3510_v5 = vld [vmem:[#allocation7 + $0x78] sm:$0xff]  }
 0x273   :  { %v4191_v31 = vmul.f32 %v1664_v19, %v3794_v29  ;;  %v3076_v62 = vadd.f32 %v3075_v23, %v3074_v16  ;;  %v1680_v61 = vsel %vm450_vm2, %v1672_v18, %v1673_v53  ;;  %v4197_v37 = vsel %vm483_vm4, %v1688_v38, %v1689_v30  ;;  %v3511_v23 = vld [vmem:[#allocation7 + $0x70] sm:$0xff]  }
 0x274   :  { %v1660_v0 = vadd.f32 %v2802_v14, %v1648_v27  ;;  %v3077_v22 = vpop.f32.mrf.mxu1  ;;  %v3145_v41 = vpop.f32.mrf.mxu0 }
 0x275   :  { %v1690_v33 = vrot.slane %v4191_v31, 1  ;;  %v1649_v9 = vadd.f32 %v3076_v62, %v1459_v56  ;;  %v4200_v4 = vadd.f32 %v3145_v41, %v3144_v60  ;;  %v1674_v10 = vrot.slane %v4191_v31, 7  ;;  %v3512_v62 = vld [vmem:[#allocation7 + $0x68] sm:$0xff]  }
 0x276   :  { %v1665_v29 = vmax.f32 %v1660_v0, 0.0  ;;  %v3078_v24 = vpop.f32.mrf.mxu1  ;;  %v3147_v57 = vpop.f32.mrf.mxu0 }
 0x277   :  { %v1661_v45 = vadd.f32 %v2802_v14, %v1649_v9  ;;  %v1679_v7 = vsel %vm450_vm2, %v1673_v53, %v1674_v10  ;;  %v4207_v20 = vsel %vm483_vm4, %v1689_v30, %v1690_v33  ;;  %v3515_v9 = vld [vmem:[#allocation7 + $0x50] sm:$0xff]  }
 0x278   :  { %v4210_v52 = vmul.f32 %v1665_v29, %v3819_v51  ;;  %v3148_v32 = vpop.f32.mrf.mxu0  ;;  %v1698_v40 = vpack.c.bf16 %v4207_v20, %v4197_v37 }
 0x279   :  { %v1666_v44 = vmax.f32 %v1661_v45, 0.0  ;;  %v4214_v43 = vadd.f32 %v3148_v32, %v3147_v57  ;;  %v3516_v57 = vld [vmem:[#allocation7 + $0x48] sm:$0xff]  }
 0x27a   :  { %v3150_v50 = vpop.f32.mrf.mxu0  ;;  %v1675_v14 = vrot.slane %v4210_v52, 7  ;;  %v1686_v3 = vpack.c.bf16 %v4210_v52, %v4191_v31  ;;  %v1691_v11 = vrot.slane %v4210_v52, 1  ;;  %v3524_v31 = vld [vmem:[#allocation7 + $0x88] sm:$0xff]   ;;  %v3525_v52 = vld [vmem:[#allocation7 + $0x80] sm:$0xff]  }
 0x27b   :  { %v4221_v1 = vmul.f32 %v1666_v44, %v3822_v55  ;;  %v3517_v44 = vld [vmem:[#allocation7 + $0x40] sm:$0xff]  }
 0x27c   :  { %v3151_v51 = vpop.f32.mrf.mxu0  ;;  %v1678_v54 = vsel %vm450_vm2, %v1674_v10, %v1675_v14  ;;  %v4227_v47 = vsel %vm483_vm4, %v1690_v33, %v1691_v11 }
 0x27d   :  { %v1676_v28 = vrot.slane %v4221_v1, 7  ;;  %v4230_v39 = vadd.f32 %v3151_v51, %v3150_v50  ;;  %v1683_v26 = vpack.c.bf16 %v1678_v54, %v1679_v7  ;;  %v1692_v42 = vrot.slane %v4221_v1, 1  ;;  %v3518_v51 = vld [vmem:[#allocation7 + $0xb8] sm:$0xff]  }
 0x27e   :  { %v3153_v13 = vpop.f32.mrf.mxu0 }
 0x27f   :  { %v1681_v55 = vsel %vm450_vm2, %v1676_v28, %v1672_v18  ;;  %v1677_v16 = vsel %vm450_vm2, %v1675_v14, %v1676_v28  ;;  %v4239_v30 = vsel %vm483_vm4, %v1691_v11, %v1692_v42  ;;  %v4243_v19 = vsel %vm483_vm4, %v1692_v42, %v1688_v38 }
 0x280   :  { %v3154_v63 = vpop.f32.mrf.mxu0  ;;  %v1682_v53 = vpack.c.bf16 %v1680_v61, %v1681_v55  ;;  %v1699_v56 = vpack.c.bf16 %v4239_v30, %v4227_v47  ;;  %v3514_v61 = vld [vmem:[#allocation7 + $0x58] sm:$0xff]   ;;  %v1684_v22 = vpack.c.bf16 %v1677_v16, %v1677_v16  ;;  %v3520_v55 = vld [vmem:[#allocation7 + $0xa8] sm:$0xff]  }
 0x281   :  { %v4245_v27 = vadd.f32 %v3154_v63, %v3153_v13  ;;  %v3519_v13 = vld [vmem:[#allocation7 + $0xb0] sm:$0xff]  }
 0x282   :  { %3232 = vmatmul.mubr.bf16.vlgmr.msra.gmra.mxu1 %v1682_v53  ;;  %v3156_v18 = vpop.f32.mrf.mxu0 }
 0x283   :  { %3244 = vmatpush3.bf16.msra.mxu1 %v3510_v5  ;;  %3235 = vmatprep.mubr.msk.bf16.mxu1 %vm3665_vm5, %v3664_v49  ;;  %v3523_v5 = vld [vmem:[#allocation7 + $0x90] sm:$0xff]  }
 0x284   :  { %v3157_v60 = vpop.f32.mrf.mxu0  ;;  %3245 = vmatprep.subr.bf16.mxu1 %v3664_v49 }
 0x287   :  { %3246 = vmatpush3.bf16.msra.mxu1 %v3511_v23 }
 0x288   :  { %3247 = vmatprep.subr.bf16.mxu1 %v3664_v49 }
 0x28a   :  { %3236 = vmatmul.mubr.bf16.gmra.mxu1 %v1683_v26 }
 0x28b   :  { %3248 = vmatpush3.bf16.msra.mxu1 %v3512_v62  ;;  %3239 = vmatprep.mubr.msk.bf16.mxu1 %vm3665_vm5, %v3664_v49 }
 0x28c   :  { %3249 = vmatprep.subr.bf16.mxu1 %v3664_v49 }
 0x28e   :  { %v3186_v38 = vpop.f32.mrf.mxu0 }
 0x28f   :  { %3250 = vmatpush3.bf16.msra.mxu1 %v3513_v8 }
 0x290   :  { %3251 = vmatprep.subr.bf16.mxu1 %v3664_v49  ;;  %v3187_v0 = vpop.f32.mrf.mxu0 }
 0x291   :  { %v4257_v41 = vadd.f32 %v3187_v0, %v3186_v38 }
 0x292   :  { %3240 = vmatmul.mubr.bf16.gmra.mxu1 %v1684_v22  ;;  %v3189_v33 = vpop.f32.mrf.mxu0 }
 0x293   :  { %3252 = vmatpush3.bf16.msra.mxu1 %v3514_v61  ;;  %3259 = vmatprep.mubr.msk.bf16.mxu1 %vm3665_vm5, %v3664_v49 }
 0x294   :  { %3253 = vmatprep.subr.bf16.mxu1 %v3664_v49  ;;  %v3190_v10 = vpop.f32.mrf.mxu0 }
 0x295   :  { %v4262_v29 = vadd.f32 %v3190_v10, %v3189_v33 }
 0x296   :  { %v3192_v24 = vpop.f32.mrf.mxu0 }
 0x297   :  { %3254 = vmatpush3.bf16.msra.mxu1 %v3515_v9 }
 0x298   :  { %3255 = vmatprep.subr.bf16.mxu1 %v3664_v49  ;;  %v3193_v45 = vpop.f32.mrf.mxu0 }
 0x299   :  { %v4265_v7 = vadd.f32 %v3193_v45, %v3192_v24 }
 0x29a   :  { %v3195_v32 = vpop.f32.mrf.mxu0 }
 0x29b   :  { %3256 = vmatpush3.bf16.msra.mxu1 %v3516_v57 }
 0x29c   :  { %3257 = vmatprep.subr.bf16.mxu1 %v3664_v49  ;;  %v3196_v50 = vpop.f32.mrf.mxu0 }
 0x29d   :  { %v4268_v14 = vadd.f32 %v3196_v50, %v3195_v32 }
 0x29e   :  { %v3198_v11 = vpop.f32.mrf.mxu0 }
 0x29f   :  { %3258 = vmatpush3.bf16.msra.mxu1 %v3517_v44 }
 0x2a0   :  { %v3199_v54 = vpop.f32.mrf.mxu0  ;;  %3271 = vmatprep.subr.bf16.mxu1 %v3664_v49 }
 0x2a1   :  { %v4271_v28 = vadd.f32 %v3199_v54, %v3198_v11 }
 0x2a2   :  { %3260 = vmatmul.mubr.bf16.vlgmr.msra.gmra.mxu1 %v1685_v17  ;;  %v3201_v26 = vpop.f32.mrf.mxu0  ;;  %v1687_v17 = vpack.c.bf16 %v4221_v1, %v4221_v1 }
 0x2a3   :  { %3272 = vmatpush3.bf16.msra.mxu1 %v3518_v51  ;;  %3263 = vmatprep.mubr.msk.bf16.mxu1 %vm3665_vm5, %v3664_v49 }
 0x2a4   :  { %v3202_v42 = vpop.f32.mrf.mxu0  ;;  %3273 = vmatprep.subr.bf16.mxu1 %v3664_v49 }
 0x2a7   :  { %3274 = vmatpush3.bf16.msra.mxu1 %v3519_v13 }
 0x2a8   :  { %3275 = vmatprep.subr.bf16.mxu1 %v3664_v49 }
 0x2aa   :  { %3264 = vmatmul.mubr.bf16.gmra.mxu1 %v1686_v3  ;;  %v1700_v3 = vpack.c.bf16 %v4243_v19, %v4243_v19 }
 0x2ab   :  { %3276 = vmatpush3.bf16.msra.mxu1 %v3520_v55  ;;  %3267 = vmatprep.mubr.msk.bf16.mxu1 %vm3665_vm5, %v3664_v49 }
 0x2ac   :  { %3277 = vmatprep.subr.bf16.mxu1 %v3664_v49 }
 0x2af   :  { %3278 = vmatpush3.bf16.msra.mxu1 %v3521_v46 }
 0x2b0   :  { %3279 = vmatprep.subr.bf16.mxu1 %v3664_v49 }
 0x2b2   :  { %3268 = vmatmul.mubr.bf16.gmra.mxu1 %v1687_v17 }
 0x2b3   :  { %3280 = vmatpush3.bf16.msra.mxu1 %v3522_v2  ;;  %3287 = vmatprep.mubr.msk.bf16.mxu1 %vm3665_vm5, %v3664_v49 }
 0x2b4   :  { %3281 = vmatprep.subr.bf16.mxu1 %v3664_v49 }
 0x2b7   :  { %3282 = vmatpush3.bf16.msra.mxu1 %v3523_v5 }
 0x2b8   :  { %3283 = vmatprep.subr.bf16.mxu1 %v3664_v49 }
 0x2bb   :  { %3284 = vmatpush3.bf16.msra.mxu1 %v3524_v31 }
 0x2bc   :  { %3285 = vmatprep.subr.bf16.mxu1 %v3664_v49 }
 0x2bf   :  { %3286 = vmatpush3.bf16.msra.mxu1 %v3525_v52 }
 0x2c2   :  { %3288 = vmatmul.mubr.bf16.vlgmr.msra.gmra.mxu1 %v1698_v40 }
 0x2c3   :  { %3291 = vmatprep.mubr.msk.bf16.mxu1 %vm3665_vm5, %v3664_v49 }
 0x2ca   :  { %3292 = vmatmul.mubr.bf16.gmra.mxu1 %v1699_v56 }
 0x2cb   :  { %3295 = vmatprep.mubr.msk.bf16.mxu1 %vm3665_vm5, %v3664_v49 }
 0x2d2   :  { %3296 = vmatmul.mubr.bf16.gmra.mxu1 %v1700_v3 }
 0x342   :  { %v1983_v1 = vpop.f32.mrf.mxu1 }
 0x343   :  { %v1984_v56 = vadd.f32 %v4155_v25, %v1983_v1 }
 0x344   :  { %v3233_v16 = vpop.f32.mrf.mxu1 }
 0x346   :  { %v1986_v63 = vpop.f32.mrf.mxu1 }
 0x347   :  { %v1987_v61 = vadd.f32 %v4157_v48, %v1986_v63 }
 0x348   :  { %v3234_v53 = vpop.f32.mrf.mxu1 }
 0x34a   :  { %v1991_v37 = vpop.f32.mrf.mxu1 }
 0x34b   :  { %v1992_v10 = vadd.f32 %v4159_v58, %v1991_v37 }
 0x34c   :  { %v3237_v20 = vpop.f32.mrf.mxu1 }
 0x34e   :  { %v1994_v40 = vpop.f32.mrf.mxu1 }
 0x34f   :  { %v1995_v25 = vadd.f32 %v4161_v12, %v1994_v40  ;;  %v2875_v12 = vld [vmem:[%s4343_s8] ss:$0 sm:$0xff]  ;;  %s3666_s8 = smov [#allocation11]  }
 0x350   :  { %v3238_v18 = vpop.f32.mrf.mxu1  ;;  %s2659_s20 = sshll.u32 %s3666_s8, 4  ;;  %s2660_s20 = int_to_ptr.vmem [resolvable:$true] %s2659_s20 }
 0x351   :  { %s3626_s6 = scalar_lea.vmem %s2660_s20, 640  ;;  %p3631_p12 = scmp.lt.s32.totalorder %s2660_s20, %s2660_s20 }
 0x352   :  { %v1999_v23 = vpop.f32.mrf.mxu1  ;;  %p3627_p11 = scmp.ne.s32.totalorder %s2660_s20, %s3626_s6  ;;  %p3632_p13 = scmp.lt.s32.totalorder %s3626_s6, %s3626_s6 }
 0x353   :  { %v2000_v48 = vadd.f32 %v4163_v15, %v1999_v23 }
 0x354   :  { %v3241_v60 = vpop.f32.mrf.mxu1  ;;  %p3633_p0 = por %p3632_p13, %p3631_p12 }
 0x356   :  { %v2002_v62 = vpop.f32.mrf.mxu1  ;;  %p3634_p1 = pnand %p3633_p0, %p3627_p11 }
 0x358   :  { %v3242_v47 = vpop.f32.mrf.mxu1 }
 0x362   :  { %v2289_v30 = vpop.f32.mrf.mxu1 }
 0x363   :  { %v2290_v49 = vadd.f32 %v4188_v34, %v2289_v30 }
 0x364   :  { %v3261_v8 = vpop.f32.mrf.mxu1 }
 0x365   :  { %v2311_v19 = vadd.f32 %v2290_v49, %v1984_v56 }
 0x366   :  { %v2292_v38 = vpop.f32.mrf.mxu1 }
 0x367   :  { %v2293_v0 = vadd.f32 %v4200_v4, %v2292_v38 }
 0x368   :  { %v3262_v22 = vpop.f32.mrf.mxu1 }
 0x369   :  { %v2312_v33 = vadd.f32 %v2293_v0, %v1987_v61 }
 0x36a   :  { %v2297_v9 = vpop.f32.mrf.mxu1 }
 0x36b   :  { %v2298_v24 = vadd.f32 %v4214_v43, %v2297_v9 }
 0x36c   :  { %v3265_v57 = vpop.f32.mrf.mxu1 }
 0x36d   :  { %v2313_v45 = vadd.f32 %v2298_v24, %v1992_v10 }
 0x36e   :  { %v2300_v32 = vpop.f32.mrf.mxu1 }
 0x36f   :  { %v2301_v34 = vadd.f32 %v4230_v39, %v2300_v32 }
 0x370   :  { %v3266_v44 = vpop.f32.mrf.mxu1 }
 0x371   :  { %v2314_v50 = vadd.f32 %v2301_v34, %v1995_v25 }
 0x372   :  { %v2305_v11 = vpop.f32.mrf.mxu1 }
 0x373   :  { %v2306_v4 = vadd.f32 %v4245_v27, %v2305_v11 }
 0x374   :  { %v3269_v51 = vpop.f32.mrf.mxu1 }
 0x375   :  { %v2315_v54 = vadd.f32 %v2306_v4, %v2000_v48 }
 0x376   :  { %v2308_v26 = vpop.f32.mrf.mxu1 }
 0x378   :  { %v3270_v58 = vpop.f32.mrf.mxu1 }
 0x382   :  { %v2600_v13 = vpop.f32.mrf.mxu1 }
 0x383   :  { %v2601_v43 = vadd.f32 %v4257_v41, %v2600_v13 }
 0x384   :  { %v3289_v42 = vpop.f32.mrf.mxu1 }
 0x385   :  { %v2622_v39 = vadd.f32 %v2601_v43, %v2311_v19 }
 0x386   :  { %v2603_v55 = vpop.f32.mrf.mxu1 }
 0x387   :  { %v2634_v46 = vadd.f32 %v2875_v12, %v2622_v39  ;;  %v2604_v2 = vadd.f32 %v4262_v29, %v2603_v55 }
 0x388   :  { %v3290_v15 = vpop.f32.mrf.mxu1 }
 0x389   :  { %v2639_v17 = vmax.f32 %v2634_v46, 0.0  ;;  %v2623_v27 = vadd.f32 %v2604_v2, %v2312_v33 }
 0x38a   :  { %v2608_v5 = vpop.f32.mrf.mxu1 }
 0x38b   :  { %v2644_v31 = vadd.f32 %v4126_v35, %v2639_v17  ;;  %v2635_v52 = vadd.f32 %v2875_v12, %v2623_v27  ;;  %v2609_v3 = vadd.f32 %v4265_v7, %v2608_v5 }
 0x38c   :  { %v3293_v41 = vpop.f32.mrf.mxu1 }
 0x38d   :  { %2649 = vst [vmem:[#allocation11] sm:$0xff] %v2644_v31  ;;  %v2640_v1 = vmax.f32 %v2635_v52, 0.0  ;;  %v2624_v16 = vadd.f32 %v2609_v3, %v2313_v45 }
 0x38e   :  { %v2611_v63 = vpop.f32.mrf.mxu1 }
 0x38f   :  { %v2645_v53 = vadd.f32 %v4129_v59, %v2640_v1  ;;  %v2636_v37 = vadd.f32 %v2875_v12, %v2624_v16  ;;  %v2612_v20 = vadd.f32 %v4268_v14, %v2611_v63 }
 0x390   :  { %v3294_v29 = vpop.f32.mrf.mxu1 }
 0x391   :  { %2650 = vst [vmem:[#allocation11 + $0x8] sm:$0xff] %v2645_v53  ;;  %v2641_v40 = vmax.f32 %v2636_v37, 0.0  ;;  %v2625_v18 = vadd.f32 %v2612_v20, %v2314_v50 }
 0x392   :  { %v2616_v23 = vpop.f32.mrf.mxu1 }
 0x393   :  { %v2646_v35 = vadd.f32 %v4132_v6, %v2641_v40  ;;  %v2637_v60 = vadd.f32 %v2875_v12, %v2625_v18  ;;  %v2617_v7 = vadd.f32 %v4271_v28, %v2616_v23 }
 0x394   :  { %v3297_v62 = vpop.f32.mrf.mxu1 }
 0x395   :  { %2651 = vst [vmem:[#allocation11 + $0x10] sm:$0xff] %v2646_v35  ;;  %v2642_v47 = vmax.f32 %v2637_v60, 0.0  ;;  %v2626_v30 = vadd.f32 %v2617_v7, %v2315_v54 }
 0x396   :  { %v2619_v56 = vpop.f32.mrf.mxu1 }
 0x397   :  { %v2647_v59 = vadd.f32 %v4135_v21, %v2642_v47  ;;  %v2638_v49 = vadd.f32 %v2875_v12, %v2626_v30 }
 0x398   :  { %v3298_v8 = vpop.f32.mrf.mxu1 }
 0x399   :  { %2652 = vst [vmem:[#allocation11 + $0x18] sm:$0xff] %v2647_v59  ;;  %v2643_v14 = vmax.f32 %v2638_v49, 0.0 }
 0x39b   :  { %v2648_v19 = vadd.f32 %v4137_v36, %v2643_v14 }
 0x39d   :  { %2653 = vst [vmem:[#allocation11 + $0x20] sm:$0xff] %v2648_v19 }
 0x39e   :  { %3637 = shalt.err (!%p3634_p1)
}
 0x39f   :  { %2665 = dma.vmem_to_hbm [thread:$0]  %s2660_s20, 640, %s4345_s10, [#allocation4], %s3659_s27, %s3659_s27, %s3660_s28  }
 0x3a0   :  { %3652 = dma.done.wait [#allocation4], 640  }
 0x3a1   :  { %3653 = vsyncadd [#allocation4], 4294966656 }
 0x3a2   :  { %2669 = vsyncpa [#allocation3], 1 }
 0x3a3   :  { %2670 = vsyncpa [#allocation6], 1 }
 0x3a4   :  { %2671 = vsyncpa [#allocation9], 1 }
 0x3a5   :  { %2672 = vsyncpa [#allocation4], 1 }

</bundles_post_ra>
